<compile_context>
chip_gen: v7x
topology: tpu7x:2x2x1
jax: 0.10.0
libtpu: 0.0.40
codegen_flags: <defaults>
</compile_context>

<pallas_src>
import math

import jax
import jax.numpy as jnp
from jax import lax
from jax.experimental import pallas as pl
from jax.experimental.pallas import tpu as pltpu


def _make_kernel(size, n_heads, n_seeds, N, Np, tb, compute_dtype):
    hs = size // n_heads
    HS = n_heads * n_seeds
    approx = compute_dtype != jnp.float32      # approx EUP recip only in fast mode

    def kernel(s_ref, x_ref, wkq_ref, bkq_ref, wv_ref, bv_ref, wo_ref, bo_ref, o_ref):
        X2 = x_ref[...]                                        # (tb*Np, size), compute dtype

        # --- attention scores for ALL heads with one wide MXU matmul ---
        # wkq = Wk @ Qblk (per-head block-diagonal q, 1/sqrt(size) folded in),
        # so the K projection never has to be materialized in the kernel.
        scores = (jnp.dot(X2, wkq_ref[...], preferred_element_type=jnp.float32)
                  + bkq_ref[...])                              # (tb*Np, HS), f32
        s3 = scores.reshape(tb, Np, HS)
        if Np != N:                                            # mask zero-padded key rows
            n_idx = lax.broadcasted_iota(jnp.int32, (1, Np, 1), 1)
            s3 = jnp.where(n_idx < N, s3, -1e30)
        m = jnp.max(s3, axis=1, keepdims=True)
        p = jnp.exp(s3 - m)
        p = p * pl.reciprocal(jnp.sum(p, axis=1, keepdims=True), approx=approx)

        # --- V projection over all tb*Np rows at once (MXU-friendly row count) ---
        v2 = (jnp.dot(X2, wv_ref[...], preferred_element_type=jnp.float32)
              + bv_ref[...]).astype(compute_dtype)
        v3 = v2.reshape(tb, Np, size)
        p_c = p.astype(compute_dtype)

        # --- per-head weighted sums, assembled in registers, ONE lane-dense store ---
        outs = []
        for h in range(n_heads):                               # static, small
            ph = p_c[:, :, h * n_seeds:(h + 1) * n_seeds]      # (tb, Np, n_seeds)
            vh = v3[:, :, h * hs:(h + 1) * hs]                 # (tb, Np, hs)
            outs.append(jnp.einsum("bns,bnd->bsd", ph, vh,
                                   preferred_element_type=jnp.float32))
        attn = jnp.concatenate(outs, axis=-1)                  # (tb, n_seeds, size), f32

        # residual with the *raw* seeds (matches the PyTorch code), then
        # set_norm_ko=False branch: out = out + relu(fc_o(out)).
        out = (s_ref[...][None, :, :] + attn).reshape(tb * n_seeds, size)
        ff = (jnp.dot(out.astype(compute_dtype), wo_ref[...],
                      preferred_element_type=jnp.float32) + bo_ref[...])
        o_ref[...] = out + jnp.maximum(ff, 0.0)

    return kernel


def _vmem_cap_bytes():
    """Physical VMEM minus headroom for Mosaic internal scratch."""
    try:
        info = pltpu.get_tpu_info()
        cap = getattr(info, "vmem_capacity_bytes", None)
        if cap:
            return int(cap) - (8 << 20)
    except Exception:
        pass
    return 56 << 20      # safe on every generation (v7x has 64 MiB per TC)


def pmapp_forward(X, params, n_heads, *, compute_dtype=jnp.float32, tb=None, eps=1e-5):
    B, N, size = X.shape
    S = params["S"][0]                             # (n_seeds, size)
    n_seeds = S.shape[0]
    assert size % n_heads == 0
    hs = size // n_heads
    HS = n_heads * n_seeds
    cdt = compute_dtype
    itemsize = jnp.dtype(cdt).itemsize

    # ---- hoisted batch-invariant seed path: SetNorm(seeds) -> Q projection ----
    mu = jnp.mean(S)
    sigma = jnp.sqrt(jnp.mean((S - mu) ** 2) + eps)
    qn = (S - mu) / sigma * params["gamma"][0] + params["beta"][0]
    q = qn @ params["Wq"] + params["bq"][0]        # (n_seeds, size), f32

    # Per-head block-diagonal Q (with the 1/sqrt(size) scale), then fold W_k in:
    #   scores = (X @ Wk + bk) @ Qblk = X @ (Wk @ Qblk) + bk @ Qblk
    scale = 1.0 / math.sqrt(size)
    qblk = jnp.zeros((size, HS), jnp.float32)
    for h in range(n_heads):
        qblk = qblk.at[h * hs:(h + 1) * hs, h * n_seeds:(h + 1) * n_seeds].set(
            (q[:, h * hs:(h + 1) * hs] * scale).T)
    wkq = (params["Wk"] @ qblk).astype(cdt)        # (size, HS)
    bkq = (params["bk"] @ qblk).astype(jnp.float32)  # (1, HS)

    # ---- pad N so the (tb*Np, .) <-> (tb, Np, .) reshapes stay layout-trivial ----
    pack = 8 * (4 // itemsize)                     # 8 for f32, 16 for bf16
    Np = -(-N // pack) * pack
    Xp = X if Np == N else jnp.pad(X, ((0, 0), (0, Np - N), (0, 0)))

    # ---- batch blocking: ~512 X rows per block; no forced >=2-step split ----
    if tb is None:
        tb = max(1, min(B, 512 // max(Np, 1)))
    r = 8 // math.gcd(n_seeds, 8)                  # keep tb*n_seeds a multiple of 8
    tb = max(r, -(-tb // r) * r)
    tb = min(tb, -(-B // r) * r)

    cap = _vmem_cap_bytes()
    const_bytes = 2 * ((size * HS + 2 * size * size) * itemsize   # wkq, Wv, Wo (worst case 2x)
                       + (HS + 2 * size) * 4                      # bkq, bv, bo
                       + n_seeds * size * 4)                      # seeds

    def blk_bytes(t):
        return (2 * t * Np * size * itemsize                      # X block (double-buffered)
                + 2 * t * n_seeds * size * 4                      # out block (double-buffered)
                + t * Np * (size * (4 + itemsize) + 2 * HS * 4)   # v2 / scores / p
                + 3 * t * n_seeds * size * 4)                     # attn / out / ff

    while tb > r and const_bytes + int(1.5 * blk_bytes(tb)) > cap:
        tb -= r

    B_pad = -(-B // tb) * tb
    grid = (B_pad // tb,)
    if B_pad != B:
        # TODO(synk): handle the ragged batch tail via index_map clamping instead of padding.
        Xp = jnp.concatenate([Xp, jnp.zeros((B_pad - B, Np, size), Xp.dtype)], axis=0)
    X2 = Xp.reshape(B_pad * Np, size).astype(cdt)  # lane-major 2-D slab

    Wv = params["Wv"].astype(cdt)
    Wo = params["Wo"].astype(cdt)
    bv = params["bv"].astype(jnp.float32)
    bo = params["bo"].astype(jnp.float32)
    S_f = S.astype(jnp.float32)

    kernel = _make_kernel(size, n_heads, n_seeds, N, Np, tb, cdt)
    out_shape = jax.ShapeDtypeStruct((B_pad * n_seeds, size), jnp.float32)

    def run(use_buffered):
        def const_spec(shape):
            if use_buffered:
                # Constant blocks never change across the grid: single-buffer them.
                return pl.BlockSpec(shape, lambda b: (0, 0), pipeline_mode=pl.Buffered(1))
            return pl.BlockSpec(shape, lambda b: (0, 0))

        in_specs = [
            const_spec((n_seeds, size)),                        # raw seeds (residual)
            pl.BlockSpec((tb * Np, size), lambda b: (b, 0)),    # X rows of this block
            const_spec((size, HS)), const_spec((1, HS)),        # folded Wk@Qblk, bk@Qblk
            const_spec((size, size)), const_spec((1, size)),    # W_v, b_v
            const_spec((size, size)), const_spec((1, size)),    # fc_o W, b
        ]
        out_spec = pl.BlockSpec((tb * n_seeds, size), lambda b: (b, 0))

        wmult = 1 if use_buffered else 2
        vmem_bytes = int(min(cap, max(16 << 20,
                                      int(1.5 * (const_bytes // 2 * wmult
                                                 + blk_bytes(tb))) + (2 << 20))))
        return pl.pallas_call(
            kernel,
            out_shape=out_shape,
            grid_spec=pltpu.PrefetchScalarGridSpec(
                num_scalar_prefetch=0,
                grid=grid,
                in_specs=in_specs,
                out_specs=out_spec,
            ),
            compiler_params=pltpu.CompilerParams(
                dimension_semantics=("parallel",),
                vmem_limit_bytes=vmem_bytes,
            ),
        )(S_f, X2, wkq, bkq, Wv, bv, Wo, bo)

    try:
        out = jax.block_until_ready(run(True))
    except Exception:
        out = run(False)   # pipeline_mode=pl.Buffered(1) unsupported on this jax build

    return out.reshape(B_pad, n_seeds, size)[:B]


def pmapp_reference(X, params, n_heads):
    """Pure-JAX mirror of the PyTorch forward (for validation)."""
    B, N, size = X.shape
    n_seeds = params["S"].shape[1]
    eps = 1e-5
    S = jnp.broadcast_to(params["S"], (B, n_seeds, size))
    mu = jnp.mean(S, axis=(1, 2), keepdims=True)
    sigma = jnp.sqrt(jnp.mean((S - mu) ** 2, axis=(1, 2), keepdims=True) + eps)
    qn = (S - mu) / sigma * params["gamma"][0] + params["beta"][0]
    q = qn @ params["Wq"] + params["bq"][0]
    k = X @ params["Wk"] + params["bk"][0]
    v = X @ params["Wv"] + params["bv"][0]
    hs = size // n_heads
    qh = q.reshape(B, n_seeds, n_heads, hs).transpose(0, 2, 1, 3)
    kh = k.reshape(B, N, n_heads, hs).transpose(0, 2, 1, 3)
    vh = v.reshape(B, N, n_heads, hs).transpose(0, 2, 1, 3)
    A = jax.nn.softmax(jnp.einsum("bhqd,bhkd->bhqk", qh, kh) / math.sqrt(size), axis=-1)
    o = jnp.einsum("bhqk,bhkd->bhqd", A, vh)
    Sh = S.reshape(B, n_seeds, n_heads, hs).transpose(0, 2, 1, 3)
    out = (Sh + o).transpose(0, 2, 1, 3).reshape(B, n_seeds, size)
    out = out + jax.nn.relu(out @ params["Wo"] + params["bo"][0])
    return out


def init_params(key, size, n_seeds):
    ks = jax.random.split(key, 12)
    bound_s = math.sqrt(6.0 / (n_seeds * size + size))     # xavier_uniform for seeds
    S = jax.random.uniform(ks[0], (1, n_seeds, size), jnp.float32, -bound_s, bound_s)
    bw = 1.0 / math.sqrt(size)                              # torch Linear default init
    lin = lambda k: jax.random.uniform(k, (size, size), jnp.float32, -bw, bw)
    bias = lambda k: jax.random.uniform(k, (1, size), jnp.float32, -bw, bw)
    return {
        "S": S,
        "gamma": jnp.ones((1, size), jnp.float32),
        "beta": jnp.zeros((1, size), jnp.float32),
        "Wq": lin(ks[1]), "bq": bias(ks[2]),
        "Wk": lin(ks[3]), "bk": bias(ks[4]),
        "Wv": lin(ks[5]), "bv": bias(ks[6]),
        "Wo": lin(ks[7]), "bo": bias(ks[8]),
    }


if __name__ == "__main__":
    B, N, size, n_heads, n_seeds = 4, 16, 32, 4, 8

    key = jax.random.PRNGKey(0)
    k_param, k_x, k_x2 = jax.random.split(key, 3)
    params = init_params(k_param, size, n_seeds)
    X = jax.random.normal(k_x, (B, N, size), jnp.float32)

    ref = pmapp_reference(X, params, n_heads)

    # f32 path, default block sizing (single grid step at this size).
    out_f32 = jax.block_until_ready(pmapp_forward(X, params, n_heads))
    assert out_f32.shape == (B, n_seeds, size)
    assert jnp.allclose(out_f32, ref, atol=1e-4, rtol=1e-4), (
        f"f32 max abs diff = {jnp.max(jnp.abs(out_f32 - ref))}")

    # bf16 matmul path (v6e/v7x MXU), f32 accumulation; relaxed tolerance.
    out_bf16 = jax.block_until_ready(
        pmapp_forward(X, params, n_heads, compute_dtype=jnp.bfloat16))
    assert jnp.allclose(out_bf16, ref, atol=5e-2, rtol=5e-2), (
        f"bf16 max abs diff = {jnp.max(jnp.abs(out_bf16 - ref))}")

    # Awkward N (exercises key-padding + -inf masking) and multi-step grid (tb=2, B padded).
    X3 = jax.random.normal(k_x2, (3, 10, size), jnp.float32)
    ref3 = pmapp_reference(X3, params, n_heads)
    out3 = jax.block_until_ready(pmapp_forward(X3, params, n_heads, tb=2))
    assert jnp.allclose(out3, ref3, atol=1e-4, rtol=1e-4), (
        f"padded-N max abs diff = {jnp.max(jnp.abs(out3 - ref3))}")

    print("KERNEL_OK")
</pallas_src>

<mosaic_0001>
module attributes {stable_mosaic.version = 11 : i64} {
  func.func @kernel(%arg0: i32, %arg1: memref<8x32xf32, #tpu.memory_space<vmem>>, %arg2: memref<64x32xf32, #tpu.memory_space<vmem>>, %arg3: memref<32x32xf32, #tpu.memory_space<vmem>>, %arg4: memref<1x32xf32, #tpu.memory_space<vmem>>, %arg5: memref<32x32xf32, #tpu.memory_space<vmem>>, %arg6: memref<1x32xf32, #tpu.memory_space<vmem>>, %arg7: memref<32x32xf32, #tpu.memory_space<vmem>>, %arg8: memref<1x32xf32, #tpu.memory_space<vmem>>, %arg9: memref<32x32xf32, #tpu.memory_space<vmem>>) attributes {dimension_semantics = [#tpu.dimension_semantics<parallel>], iteration_bounds = array<i64: 1>, scalar_prefetch = 0 : i64, scratch_operands = 0 : i64, tpu.core_type = #tpu.core_type<tc>, window_params = [{pipeline_mode = #tpu.pipeline_mode<synchronous>, transform_indices = @transform_0, window_bounds = array<i64: 8, 32>}, {transform_indices = @transform_1, window_bounds = array<i64: 64, 32>}, {pipeline_mode = #tpu.pipeline_mode<synchronous>, transform_indices = @transform_2, window_bounds = array<i64: 32, 32>}, {pipeline_mode = #tpu.pipeline_mode<synchronous>, transform_indices = @transform_3, window_bounds = array<i64: 1, 32>}, {pipeline_mode = #tpu.pipeline_mode<synchronous>, transform_indices = @transform_4, window_bounds = array<i64: 32, 32>}, {pipeline_mode = #tpu.pipeline_mode<synchronous>, transform_indices = @transform_5, window_bounds = array<i64: 1, 32>}, {pipeline_mode = #tpu.pipeline_mode<synchronous>, transform_indices = @transform_6, window_bounds = array<i64: 32, 32>}, {pipeline_mode = #tpu.pipeline_mode<synchronous>, transform_indices = @transform_7, window_bounds = array<i64: 1, 32>}, {transform_indices = @transform_8, window_bounds = array<i64: 32, 32>}]} {
    %c0 = arith.constant 0 : index
    %c0_0 = arith.constant 0 : index
    %0 = vector.load %arg2[%c0, %c0_0] : memref<64x32xf32, #tpu.memory_space<vmem>>, vector<64x32xf32>
    %c0_1 = arith.constant 0 : index
    %c0_2 = arith.constant 0 : index
    %1 = vector.load %arg3[%c0_1, %c0_2] : memref<32x32xf32, #tpu.memory_space<vmem>>, vector<32x32xf32>
    %cst = arith.constant dense<0.000000e+00> : vector<64x32xf32>
    %2 = tpu.matmul %0, %1, %cst {dimension_numbers = #tpu.dot_dimension_numbers<[1], [0], [0], [1], [0, 0, 1, 1], [], []>} : vector<64x32xf32>, vector<32x32xf32>, vector<64x32xf32> -> vector<64x32xf32>
    %c0_3 = arith.constant 0 : index
    %c0_4 = arith.constant 0 : index
    %3 = vector.load %arg4[%c0_3, %c0_4] : memref<1x32xf32, #tpu.memory_space<vmem>>, vector<1x32xf32>
    %4 = vector.broadcast %3 : vector<1x32xf32> to vector<64x32xf32>
    %5 = arith.addf %2, %4 : vector<64x32xf32>
    %6 = vector.shape_cast %5 : vector<64x32xf32> to vector<4x16x32xf32>
    %cst_5 = arith.constant dense<0xFF800000> : vector<4x32xf32>
    %7 = vector.multi_reduction <maximumf>, %6, %cst_5 [1] : vector<4x16x32xf32> to vector<4x32xf32>
    %8 = vector.shape_cast %7 : vector<4x32xf32> to vector<4x1x32xf32>
    %9 = vector.broadcast %8 : vector<4x1x32xf32> to vector<4x16x32xf32>
    %10 = arith.subf %6, %9 : vector<4x16x32xf32>
    %11 = math.exp %10 : vector<4x16x32xf32>
    %cst_6 = arith.constant dense<0.000000e+00> : vector<4x32xf32>
    %12 = vector.multi_reduction <add>, %11, %cst_6 [1] : vector<4x16x32xf32> to vector<4x32xf32>
    %13 = vector.shape_cast %12 : vector<4x32xf32> to vector<4x1x32xf32>
    %14 = tpu.reciprocal %13 : vector<4x1x32xf32> -> vector<4x1x32xf32>
    %15 = vector.broadcast %14 : vector<4x1x32xf32> to vector<4x16x32xf32>
    %16 = arith.mulf %11, %15 : vector<4x16x32xf32>
    %c0_7 = arith.constant 0 : index
    %c0_8 = arith.constant 0 : index
    %17 = vector.load %arg5[%c0_7, %c0_8] : memref<32x32xf32, #tpu.memory_space<vmem>>, vector<32x32xf32>
    %cst_9 = arith.constant dense<0.000000e+00> : vector<64x32xf32>
    %18 = tpu.matmul %0, %17, %cst_9 {dimension_numbers = #tpu.dot_dimension_numbers<[1], [0], [0], [1], [0, 0, 1, 1], [], []>} : vector<64x32xf32>, vector<32x32xf32>, vector<64x32xf32> -> vector<64x32xf32>
    %c0_10 = arith.constant 0 : index
    %c0_11 = arith.constant 0 : index
    %19 = vector.load %arg6[%c0_10, %c0_11] : memref<1x32xf32, #tpu.memory_space<vmem>>, vector<1x32xf32>
    %20 = vector.broadcast %19 : vector<1x32xf32> to vector<64x32xf32>
    %21 = arith.addf %18, %20 : vector<64x32xf32>
    %22 = vector.shape_cast %21 : vector<64x32xf32> to vector<4x16x32xf32>
    %23 = vector.extract_strided_slice %16 {offsets = [0, 0, 0], sizes = [4, 16, 8], strides = [1, 1, 1]} : vector<4x16x32xf32> to vector<4x16x8xf32>
    %24 = vector.extract_strided_slice %22 {offsets = [0, 0, 0], sizes = [4, 16, 8], strides = [1, 1, 1]} : vector<4x16x32xf32> to vector<4x16x8xf32>
    "tpu.trace_start"() <{level = 10 : i32, message = "bns,bnd->bsd"}> : () -> ()
    %cst_12 = arith.constant dense<0.000000e+00> : vector<4x8x8xf32>
    %25 = tpu.matmul %23, %24, %cst_12 {dimension_numbers = #tpu.dot_dimension_numbers<[1], [1], [2], [2], [0, 0, 0, 2, 1, 2], [0], [0]>} : vector<4x16x8xf32>, vector<4x16x8xf32>, vector<4x8x8xf32> -> vector<4x8x8xf32>
    "tpu.trace_stop"() : () -> ()
    %26 = vector.extract_strided_slice %16 {offsets = [0, 0, 8], sizes = [4, 16, 8], strides = [1, 1, 1]} : vector<4x16x32xf32> to vector<4x16x8xf32>
    %27 = vector.extract_strided_slice %22 {offsets = [0, 0, 8], sizes = [4, 16, 8], strides = [1, 1, 1]} : vector<4x16x32xf32> to vector<4x16x8xf32>
    "tpu.trace_start"() <{level = 10 : i32, message = "bns,bnd->bsd"}> : () -> ()
    %cst_13 = arith.constant dense<0.000000e+00> : vector<4x8x8xf32>
    %28 = tpu.matmul %26, %27, %cst_13 {dimension_numbers = #tpu.dot_dimension_numbers<[1], [1], [2], [2], [0, 0, 0, 2, 1, 2], [0], [0]>} : vector<4x16x8xf32>, vector<4x16x8xf32>, vector<4x8x8xf32> -> vector<4x8x8xf32>
    "tpu.trace_stop"() : () -> ()
    %29 = vector.extract_strided_slice %16 {offsets = [0, 0, 16], sizes = [4, 16, 8], strides = [1, 1, 1]} : vector<4x16x32xf32> to vector<4x16x8xf32>
    %30 = vector.extract_strided_slice %22 {offsets = [0, 0, 16], sizes = [4, 16, 8], strides = [1, 1, 1]} : vector<4x16x32xf32> to vector<4x16x8xf32>
    "tpu.trace_start"() <{level = 10 : i32, message = "bns,bnd->bsd"}> : () -> ()
    %cst_14 = arith.constant dense<0.000000e+00> : vector<4x8x8xf32>
    %31 = tpu.matmul %29, %30, %cst_14 {dimension_numbers = #tpu.dot_dimension_numbers<[1], [1], [2], [2], [0, 0, 0, 2, 1, 2], [0], [0]>} : vector<4x16x8xf32>, vector<4x16x8xf32>, vector<4x8x8xf32> -> vector<4x8x8xf32>
    "tpu.trace_stop"() : () -> ()
    %32 = vector.extract_strided_slice %16 {offsets = [0, 0, 24], sizes = [4, 16, 8], strides = [1, 1, 1]} : vector<4x16x32xf32> to vector<4x16x8xf32>
    %33 = vector.extract_strided_slice %22 {offsets = [0, 0, 24], sizes = [4, 16, 8], strides = [1, 1, 1]} : vector<4x16x32xf32> to vector<4x16x8xf32>
    "tpu.trace_start"() <{level = 10 : i32, message = "bns,bnd->bsd"}> : () -> ()
    %cst_15 = arith.constant dense<0.000000e+00> : vector<4x8x8xf32>
    %34 = tpu.matmul %32, %33, %cst_15 {dimension_numbers = #tpu.dot_dimension_numbers<[1], [1], [2], [2], [0, 0, 0, 2, 1, 2], [0], [0]>} : vector<4x16x8xf32>, vector<4x16x8xf32>, vector<4x8x8xf32> -> vector<4x8x8xf32>
    "tpu.trace_stop"() : () -> ()
    %35 = tpu.concatenate %25, %28, %31, %34 in 2 : vector<4x8x8xf32>, vector<4x8x8xf32>, vector<4x8x8xf32>, vector<4x8x8xf32> -> vector<4x8x32xf32>
    %c0_16 = arith.constant 0 : index
    %c0_17 = arith.constant 0 : index
    %36 = vector.load %arg1[%c0_16, %c0_17] : memref<8x32xf32, #tpu.memory_space<vmem>>, vector<8x32xf32>
    %37 = vector.shape_cast %36 : vector<8x32xf32> to vector<1x8x32xf32>
    %38 = vector.broadcast %37 : vector<1x8x32xf32> to vector<4x8x32xf32>
    %39 = arith.addf %38, %35 : vector<4x8x32xf32>
    %40 = vector.shape_cast %39 : vector<4x8x32xf32> to vector<32x32xf32>
    %c0_18 = arith.constant 0 : index
    %c0_19 = arith.constant 0 : index
    %41 = vector.load %arg7[%c0_18, %c0_19] : memref<32x32xf32, #tpu.memory_space<vmem>>, vector<32x32xf32>
    %cst_20 = arith.constant dense<0.000000e+00> : vector<32x32xf32>
    %42 = tpu.matmul %40, %41, %cst_20 {dimension_numbers = #tpu.dot_dimension_numbers<[1], [0], [0], [1], [0, 0, 1, 1], [], []>} : vector<32x32xf32>, vector<32x32xf32>, vector<32x32xf32> -> vector<32x32xf32>
    %c0_21 = arith.constant 0 : index
    %c0_22 = arith.constant 0 : index
    %43 = vector.load %arg8[%c0_21, %c0_22] : memref<1x32xf32, #tpu.memory_space<vmem>>, vector<1x32xf32>
    %44 = vector.broadcast %43 : vector<1x32xf32> to vector<32x32xf32>
    %45 = arith.addf %42, %44 : vector<32x32xf32>
    %cst_23 = arith.constant 0.000000e+00 : f32
    %46 = vector.broadcast %cst_23 : f32 to vector<32x32xf32>
    %47 = arith.maximumf %45, %46 : vector<32x32xf32>
    %48 = arith.addf %40, %47 : vector<32x32xf32>
    %c0_24 = arith.constant 0 : index
    %c0_25 = arith.constant 0 : index
    %49 = vector.load %arg9[%c0_24, %c0_25] : memref<32x32xf32, #tpu.memory_space<vmem>>, vector<32x32xf32>
    tpu.vector_store %arg9[%c0_24, %c0_25], %48 {strides = array<i32>} : memref<32x32xf32, #tpu.memory_space<vmem>>, vector<32x32xf32>,
    return
  }
  func.func @transform_0(%arg0: i32) -> (i32, i32) {
    %c0_i32 = arith.constant 0 : i32
    %c0_i32_0 = arith.constant 0 : i32
    %c0_i32_1 = arith.constant 0 : i32
    return %c0_i32, %c0_i32_0 : i32, i32
  }
  func.func @transform_1(%arg0: i32) -> (i32, i32) {
    %c0_i32 = arith.constant 0 : i32
    %c0_i32_0 = arith.constant 0 : i32
    return %arg0, %c0_i32 : i32, i32
  }
  func.func @transform_2(%arg0: i32) -> (i32, i32) {
    %c0_i32 = arith.constant 0 : i32
    %c0_i32_0 = arith.constant 0 : i32
    %c0_i32_1 = arith.constant 0 : i32
    return %c0_i32, %c0_i32_0 : i32, i32
  }
  func.func @transform_3(%arg0: i32) -> (i32, i32) {
    %c0_i32 = arith.constant 0 : i32
    %c0_i32_0 = arith.constant 0 : i32
    %c0_i32_1 = arith.constant 0 : i32
    return %c0_i32, %c0_i32_0 : i32, i32
  }
  func.func @transform_4(%arg0: i32) -> (i32, i32) {
    %c0_i32 = arith.constant 0 : i32
    %c0_i32_0 = arith.constant 0 : i32
    %c0_i32_1 = arith.constant 0 : i32
    return %c0_i32, %c0_i32_0 : i32, i32
  }
  func.func @transform_5(%arg0: i32) -> (i32, i32) {
    %c0_i32 = arith.constant 0 : i32
    %c0_i32_0 = arith.constant 0 : i32
    %c0_i32_1 = arith.constant 0 : i32
    return %c0_i32, %c0_i32_0 : i32, i32
  }
  func.func @transform_6(%arg0: i32) -> (i32, i32) {
    %c0_i32 = arith.constant 0 : i32
    %c0_i32_0 = arith.constant 0 : i32
    %c0_i32_1 = arith.constant 0 : i32
    return %c0_i32, %c0_i32_0 : i32, i32
  }
  func.func @transform_7(%arg0: i32) -> (i32, i32) {
    %c0_i32 = arith.constant 0 : i32
    %c0_i32_0 = arith.constant 0 : i32
    %c0_i32_1 = arith.constant 0 : i32
    return %c0_i32, %c0_i32_0 : i32, i32
  }
  func.func @transform_8(%arg0: i32) -> (i32, i32) {
    %c0_i32 = arith.constant 0 : i32
    %c0_i32_0 = arith.constant 0 : i32
    return %arg0, %c0_i32 : i32, i32
  }
}

module attributes {stable_mosaic.version = 11 : i64} {
  func.func @kernel(%arg0: i32, %arg1: memref<8x32xf32, #tpu.memory_space<vmem>>, %arg2: memref<64x32xf32, #tpu.memory_space<vmem>>, %arg3: memref<32x32xf32, #tpu.memory_space<vmem>>, %arg4: memref<1x32xf32, #tpu.memory_space<vmem>>, %arg5: memref<32x32xf32, #tpu.memory_space<vmem>>, %arg6: memref<1x32xf32, #tpu.memory_space<vmem>>, %arg7: memref<32x32xf32, #tpu.memory_space<vmem>>, %arg8: memref<1x32xf32, #tpu.memory_space<vmem>>, %arg9: memref<32x32xf32, #tpu.memory_space<vmem>>) attributes {dimension_semantics = [#tpu.dimension_semantics<parallel>], iteration_bounds = array<i64: 1>, scalar_prefetch = 0 : i64, scratch_operands = 0 : i64, tpu.core_type = #tpu.core_type<tc>, window_params = [{pipeline_mode = #tpu.pipeline_mode<synchronous>, transform_indices = @transform_0, window_bounds = array<i64: 8, 32>}, {transform_indices = @transform_1, window_bounds = array<i64: 64, 32>}, {pipeline_mode = #tpu.pipeline_mode<synchronous>, transform_indices = @transform_2, window_bounds = array<i64: 32, 32>}, {pipeline_mode = #tpu.pipeline_mode<synchronous>, transform_indices = @transform_3, window_bounds = array<i64: 1, 32>}, {pipeline_mode = #tpu.pipeline_mode<synchronous>, transform_indices = @transform_4, window_bounds = array<i64: 32, 32>}, {pipeline_mode = #tpu.pipeline_mode<synchronous>, transform_indices = @transform_5, window_bounds = array<i64: 1, 32>}, {pipeline_mode = #tpu.pipeline_mode<synchronous>, transform_indices = @transform_6, window_bounds = array<i64: 32, 32>}, {pipeline_mode = #tpu.pipeline_mode<synchronous>, transform_indices = @transform_7, window_bounds = array<i64: 1, 32>}, {transform_indices = @transform_8, window_bounds = array<i64: 32, 32>}]} {
    %c0 = arith.constant 0 : index
    %c0_0 = arith.constant 0 : index
    %0 = vector.load %arg2[%c0, %c0_0] : memref<64x32xf32, #tpu.memory_space<vmem>>, vector<64x32xf32>
    %c0_1 = arith.constant 0 : index
    %c0_2 = arith.constant 0 : index
    %1 = vector.load %arg3[%c0_1, %c0_2] : memref<32x32xf32, #tpu.memory_space<vmem>>, vector<32x32xf32>
    %cst = arith.constant dense<0.000000e+00> : vector<64x32xf32>
    %2 = tpu.matmul %0, %1, %cst {dimension_numbers = #tpu.dot_dimension_numbers<[1], [0], [0], [1], [0, 0, 1, 1], [], []>} : vector<64x32xf32>, vector<32x32xf32>, vector<64x32xf32> -> vector<64x32xf32>
    %c0_3 = arith.constant 0 : index
    %c0_4 = arith.constant 0 : index
    %3 = vector.load %arg4[%c0_3, %c0_4] : memref<1x32xf32, #tpu.memory_space<vmem>>, vector<1x32xf32>
    %4 = vector.broadcast %3 : vector<1x32xf32> to vector<64x32xf32>
    %5 = arith.addf %2, %4 : vector<64x32xf32>
    %6 = vector.shape_cast %5 : vector<64x32xf32> to vector<4x16x32xf32>
    %cst_5 = arith.constant dense<0xFF800000> : vector<4x32xf32>
    %7 = vector.multi_reduction <maximumf>, %6, %cst_5 [1] : vector<4x16x32xf32> to vector<4x32xf32>
    %8 = vector.shape_cast %7 : vector<4x32xf32> to vector<4x1x32xf32>
    %9 = vector.broadcast %8 : vector<4x1x32xf32> to vector<4x16x32xf32>
    %10 = arith.subf %6, %9 : vector<4x16x32xf32>
    %11 = math.exp %10 : vector<4x16x32xf32>
    %cst_6 = arith.constant dense<0.000000e+00> : vector<4x32xf32>
    %12 = vector.multi_reduction <add>, %11, %cst_6 [1] : vector<4x16x32xf32> to vector<4x32xf32>
    %13 = vector.shape_cast %12 : vector<4x32xf32> to vector<4x1x32xf32>
    %14 = tpu.reciprocal %13 : vector<4x1x32xf32> -> vector<4x1x32xf32>
    %15 = vector.broadcast %14 : vector<4x1x32xf32> to vector<4x16x32xf32>
    %16 = arith.mulf %11, %15 : vector<4x16x32xf32>
    %c0_7 = arith.constant 0 : index
    %c0_8 = arith.constant 0 : index
    %17 = vector.load %arg5[%c0_7, %c0_8] : memref<32x32xf32, #tpu.memory_space<vmem>>, vector<32x32xf32>
    %cst_9 = arith.constant dense<0.000000e+00> : vector<64x32xf32>
    %18 = tpu.matmul %0, %17, %cst_9 {dimension_numbers = #tpu.dot_dimension_numbers<[1], [0], [0], [1], [0, 0, 1, 1], [], []>} : vector<64x32xf32>, vector<32x32xf32>, vector<64x32xf32> -> vector<64x32xf32>
    %c0_10 = arith.constant 0 : index
    %c0_11 = arith.constant 0 : index
    %19 = vector.load %arg6[%c0_10, %c0_11] : memref<1x32xf32, #tpu.memory_space<vmem>>, vector<1x32xf32>
    %20 = vector.broadcast %19 : vector<1x32xf32> to vector<64x32xf32>
    %21 = arith.addf %18, %20 : vector<64x32xf32>
    %22 = vector.shape_cast %21 : vector<64x32xf32> to vector<4x16x32xf32>
    %23 = vector.extract_strided_slice %16 {offsets = [0, 0, 0], sizes = [4, 16, 8], strides = [1, 1, 1]} : vector<4x16x32xf32> to vector<4x16x8xf32>
    %24 = vector.extract_strided_slice %22 {offsets = [0, 0, 0], sizes = [4, 16, 8], strides = [1, 1, 1]} : vector<4x16x32xf32> to vector<4x16x8xf32>
    "tpu.trace_start"() <{level = 10 : i32, message = "bns,bnd->bsd"}> : () -> ()
    %cst_12 = arith.constant dense<0.000000e+00> : vector<4x8x8xf32>
    %25 = tpu.matmul %23, %24, %cst_12 {dimension_numbers = #tpu.dot_dimension_numbers<[1], [1], [2], [2], [0, 0, 0, 2, 1, 2], [0], [0]>} : vector<4x16x8xf32>, vector<4x16x8xf32>, vector<4x8x8xf32> -> vector<4x8x8xf32>
    "tpu.trace_stop"() : () -> ()
    %26 = vector.extract_strided_slice %16 {offsets = [0, 0, 8], sizes = [4, 16, 8], strides = [1, 1, 1]} : vector<4x16x32xf32> to vector<4x16x8xf32>
    %27 = vector.extract_strided_slice %22 {offsets = [0, 0, 8], sizes = [4, 16, 8], strides = [1, 1, 1]} : vector<4x16x32xf32> to vector<4x16x8xf32>
    "tpu.trace_start"() <{level = 10 : i32, message = "bns,bnd->bsd"}> : () -> ()
    %cst_13 = arith.constant dense<0.000000e+00> : vector<4x8x8xf32>
    %28 = tpu.matmul %26, %27, %cst_13 {dimension_numbers = #tpu.dot_dimension_numbers<[1], [1], [2], [2], [0, 0, 0, 2, 1, 2], [0], [0]>} : vector<4x16x8xf32>, vector<4x16x8xf32>, vector<4x8x8xf32> -> vector<4x8x8xf32>
    "tpu.trace_stop"() : () -> ()
    %29 = vector.extract_strided_slice %16 {offsets = [0, 0, 16], sizes = [4, 16, 8], strides = [1, 1, 1]} : vector<4x16x32xf32> to vector<4x16x8xf32>
    %30 = vector.extract_strided_slice %22 {offsets = [0, 0, 16], sizes = [4, 16, 8], strides = [1, 1, 1]} : vector<4x16x32xf32> to vector<4x16x8xf32>
    "tpu.trace_start"() <{level = 10 : i32, message = "bns,bnd->bsd"}> : () -> ()
    %cst_14 = arith.constant dense<0.000000e+00> : vector<4x8x8xf32>
    %31 = tpu.matmul %29, %30, %cst_14 {dimension_numbers = #tpu.dot_dimension_numbers<[1], [1], [2], [2], [0, 0, 0, 2, 1, 2], [0], [0]>} : vector<4x16x8xf32>, vector<4x16x8xf32>, vector<4x8x8xf32> -> vector<4x8x8xf32>
    "tpu.trace_stop"() : () -> ()
    %32 = vector.extract_strided_slice %16 {offsets = [0, 0, 24], sizes = [4, 16, 8], strides = [1, 1, 1]} : vector<4x16x32xf32> to vector<4x16x8xf32>
    %33 = vector.extract_strided_slice %22 {offsets = [0, 0, 24], sizes = [4, 16, 8], strides = [1, 1, 1]} : vector<4x16x32xf32> to vector<4x16x8xf32>
    "tpu.trace_start"() <{level = 10 : i32, message = "bns,bnd->bsd"}> : () -> ()
    %cst_15 = arith.constant dense<0.000000e+00> : vector<4x8x8xf32>
    %34 = tpu.matmul %32, %33, %cst_15 {dimension_numbers = #tpu.dot_dimension_numbers<[1], [1], [2], [2], [0, 0, 0, 2, 1, 2], [0], [0]>} : vector<4x16x8xf32>, vector<4x16x8xf32>, vector<4x8x8xf32> -> vector<4x8x8xf32>
    "tpu.trace_stop"() : () -> ()
    %35 = tpu.concatenate %25, %28, %31, %34 in 2 : vector<4x8x8xf32>, vector<4x8x8xf32>, vector<4x8x8xf32>, vector<4x8x8xf32> -> vector<4x8x32xf32>
    %c0_16 = arith.constant 0 : index
    %c0_17 = arith.constant 0 : index
    %36 = vector.load %arg1[%c0_16, %c0_17] : memref<8x32xf32, #tpu.memory_space<vmem>>, vector<8x32xf32>
    %37 = vector.shape_cast %36 : vector<8x32xf32> to vector<1x8x32xf32>
    %38 = vector.broadcast %37 : vector<1x8x32xf32> to vector<4x8x32xf32>
    %39 = arith.addf %38, %35 : vector<4x8x32xf32>
    %40 = vector.shape_cast %39 : vector<4x8x32xf32> to vector<32x32xf32>
    %c0_18 = arith.constant 0 : index
    %c0_19 = arith.constant 0 : index
    %41 = vector.load %arg7[%c0_18, %c0_19] : memref<32x32xf32, #tpu.memory_space<vmem>>, vector<32x32xf32>
    %cst_20 = arith.constant dense<0.000000e+00> : vector<32x32xf32>
    %42 = tpu.matmul %40, %41, %cst_20 {dimension_numbers = #tpu.dot_dimension_numbers<[1], [0], [0], [1], [0, 0, 1, 1], [], []>} : vector<32x32xf32>, vector<32x32xf32>, vector<32x32xf32> -> vector<32x32xf32>
    %c0_21 = arith.constant 0 : index
    %c0_22 = arith.constant 0 : index
    %43 = vector.load %arg8[%c0_21, %c0_22] : memref<1x32xf32, #tpu.memory_space<vmem>>, vector<1x32xf32>
    %44 = vector.broadcast %43 : vector<1x32xf32> to vector<32x32xf32>
    %45 = arith.addf %42, %44 : vector<32x32xf32>
    %cst_23 = arith.constant 0.000000e+00 : f32
    %46 = vector.broadcast %cst_23 : f32 to vector<32x32xf32>
    %47 = arith.maximumf %45, %46 : vector<32x32xf32>
    %48 = arith.addf %40, %47 : vector<32x32xf32>
    %c0_24 = arith.constant 0 : index
    %c0_25 = arith.constant 0 : index
    %49 = vector.load %arg9[%c0_24, %c0_25] : memref<32x32xf32, #tpu.memory_space<vmem>>, vector<32x32xf32>
    tpu.vector_store %arg9[%c0_24, %c0_25], %48 {strides = array<i32>} : memref<32x32xf32, #tpu.memory_space<vmem>>, vector<32x32xf32>,
    return
  }
  func.func @transform_0(%arg0: i32) -> (i32, i32) {
    %c0_i32 = arith.constant 0 : i32
    %c0_i32_0 = arith.constant 0 : i32
    %c0_i32_1 = arith.constant 0 : i32
    return %c0_i32, %c0_i32_0 : i32, i32
  }
  func.func @transform_1(%arg0: i32) -> (i32, i32) {
    %c0_i32 = arith.constant 0 : i32
    %c0_i32_0 = arith.constant 0 : i32
    return %arg0, %c0_i32 : i32, i32
  }
  func.func @transform_2(%arg0: i32) -> (i32, i32) {
    %c0_i32 = arith.constant 0 : i32
    %c0_i32_0 = arith.constant 0 : i32
    %c0_i32_1 = arith.constant 0 : i32
    return %c0_i32, %c0_i32_0 : i32, i32
  }
  func.func @transform_3(%arg0: i32) -> (i32, i32) {
    %c0_i32 = arith.constant 0 : i32
    %c0_i32_0 = arith.constant 0 : i32
    %c0_i32_1 = arith.constant 0 : i32
    return %c0_i32, %c0_i32_0 : i32, i32
  }
  func.func @transform_4(%arg0: i32) -> (i32, i32) {
    %c0_i32 = arith.constant 0 : i32
    %c0_i32_0 = arith.constant 0 : i32
    %c0_i32_1 = arith.constant 0 : i32
    return %c0_i32, %c0_i32_0 : i32, i32
  }
  func.func @transform_5(%arg0: i32) -> (i32, i32) {
    %c0_i32 = arith.constant 0 : i32
    %c0_i32_0 = arith.constant 0 : i32
    %c0_i32_1 = arith.constant 0 : i32
    return %c0_i32, %c0_i32_0 : i32, i32
  }
  func.func @transform_6(%arg0: i32) -> (i32, i32) {
    %c0_i32 = arith.constant 0 : i32
    %c0_i32_0 = arith.constant 0 : i32
    %c0_i32_1 = arith.constant 0 : i32
    return %c0_i32, %c0_i32_0 : i32, i32
  }
  func.func @transform_7(%arg0: i32) -> (i32, i32) {
    %c0_i32 = arith.constant 0 : i32
    %c0_i32_0 = arith.constant 0 : i32
    %c0_i32_1 = arith.constant 0 : i32
    return %c0_i32, %c0_i32_0 : i32, i32
  }
  func.func @transform_8(%arg0: i32) -> (i32, i32) {
    %c0_i32 = arith.constant 0 : i32
    %c0_i32_0 = arith.constant 0 : i32
    return %arg0, %c0_i32 : i32, i32
  }
}

</mosaic_0001>

<bundles_post_ra>
// kernel: tpu_custom_call.1
= control target key start
LH: loop header
LB: loop body
LE: loop exit
PB: predicated region body
PF: predicated region fallthrough
CT: control target
= control target key end

     0   :  { %13 = vsyncpa [#allocation3], 0  ;;  %s3392_s0 = inlined_call_operand.hbm [shape: f32[8,32], index: 0, kind: input, shape index: {}]   ;;  %s3393_s1 = inlined_call_operand.vmem [shape: f32[64,32], index: 1, kind: input, shape index: {}]   ;;  %s3394_s2 = inlined_call_operand.vmem [shape: f32[32,32], index: 2, kind: input, shape index: {}]   ;;  %s3395_s3 = inlined_call_operand.vmem [shape: f32[1,32], index: 3, kind: input, shape index: {}]   ;;  %s3396_s4 = inlined_call_operand.vmem [shape: f32[32,32], index: 4, kind: input, shape index: {}]   ;;  %s3397_s5 = inlined_call_operand.vmem [shape: f32[1,32], index: 5, kind: input, shape index: {}]   ;;  %s3398_s6 = inlined_call_operand.vmem [shape: f32[32,32], index: 6, kind: input, shape index: {}]   ;;  %s3399_s7 = inlined_call_operand.vmem [shape: f32[1,32], index: 7, kind: input, shape index: {}]   ;;  %s3400_s8 = inlined_call_operand.hbm [shape: f32[32,32], index: 8, kind: output, shape index: {}]  }
   0x1   :  { %14 = vsyncpa [#allocation4], 0  ;;  %s2961_s27 = smov [#allocation2]   ;;  %s2913_s9 = scalar_lea.hbm %s3392_s0, 128 }
   0x2   :  { %s21_s28 = sshll.u32 %s2961_s27, 4  ;;  %p2914_p0 = scmp.ne.s32.totalorder %s3392_s0, %s2913_s9  ;;  %s22_s28 = int_to_ptr.vmem [resolvable:$true] %s21_s28 }
   0x3   :  { %p2917_p1 = scmp.lt.u32.totalorder %s2913_s9, %s3392_s0 }
   0x5   :  { %p2919_p2 = pnand %p2917_p1, %p2914_p0 }
   0x7   :  { %2922 = shalt.err (!%p2919_p2)
}
   0x8   :  { %s2923_s14 = scalar_lea.vmem %s22_s28, 128  ;;  %p2928_p4 = scmp.lt.s32.totalorder %s22_s28, %s22_s28 }
   0x9   :  { %p2924_p3 = scmp.ne.s32.totalorder %s22_s28, %s2923_s14  ;;  %p2929_p5 = scmp.lt.s32.totalorder %s2923_s14, %s2923_s14 }
   0xb   :  { %p2930_p6 = por %p2929_p5, %p2928_p4 }
   0xd   :  { %p2931_p7 = pnand %p2930_p6, %p2924_p3 }
   0xf   :  { %2934 = shalt.err (!%p2931_p7)
}
  0x10   :  { %24 = dma.hbm_to_vmem [thread:$0]  %s3392_s0, 128, %s22_s28, [#allocation3]  }
  0x11   :  { %2957 = dma.done.wait [#allocation3], 128  }
  0x12   :  { %2958 = vsyncadd [#allocation3], 4294967168  ;;  %vm61_vm0 = vcmask 261120   ;;  %v50_v0 = vld [vmem:[%s3394_s2] sm:$0xff]  ;;  %v51_v1 = vld [vmem:[%s3394_s2 + $0x8] sm:$0xff]  ;;  %v2962_v20 = vmov 0.0|0.0  }
  0x13   :  { %v52_v2 = vld [vmem:[%s3394_s2 + $0x10] sm:$0xff]  ;;  %v2745_v3 = vpack.c.bf16 %v51_v1, %v50_v0  ;;  %v53_v4 = vld [vmem:[%s3394_s2 + $0x18] sm:$0xff]  ;;  %v42_v5 = vld [vmem:[%s3393_s1] sm:$0xff]  ;;  %s2965_s26 = smov 104   ;;  %vm2966_vm1 = vmmov 0   ;;  %vm447_vm2 = vcmask 130048  }
  0x14   :  { %v2749_v6 = vpack.c.bf16 %v53_v4, %v52_v2  ;;  %2587 = vmatprep.mubr.msk.f32.mxu0 %vm61_vm0, %v42_v5  ;;  %v299_v7 = vld [vmem:[%s3396_s4] sm:$0xff]  ;;  %2607 = vmatprep.mubr.msk.f32.mxu1 %vm61_vm0, %v42_v5  ;;  %v300_v8 = vld [vmem:[%s3396_s4 + $0x8] sm:$0xff]  ;;  %v301_v9 = vld [vmem:[%s3396_s4 + $0x10] sm:$0xff]  ;;  %s2968_s27 = smov 8   ;;  %s2969_s13 = smov 16   ;;  %vm2304_vm3 = vcmask 64512  }
  0x15   :  { %2746 = vmatprep.subr.bf16.mxu0 %v2745_v3  ;;  %v302_v10 = vld [vmem:[%s3396_s4 + $0x18] sm:$0xff]  ;;  %v2753_v11 = vpack.c.bf16 %v300_v8, %v299_v7  ;;  %v43_v13 = vld [vmem:[%s3393_s1 + $0x8] sm:$0xff]  ;;  %v44_v14 = vld [vmem:[%s3393_s1 + $0x10] sm:$0xff]  ;;  %s2970_s14 = smov 24   ;;  %vm2313_vm4 = vcmask 195584   ;;  %s2971_s15 = smov [#allocation5]  }
  0x16   :  { %2748 = vmatpush3.bf16.msra.mxu0 %v2745_v3  ;;  %v2757_v12 = vpack.c.bf16 %v302_v10, %v301_v9  ;;  %v45_v15 = vld [vmem:[%s3393_s1 + $0x18] sm:$0xff]  ;;  %v46_v16 = vld [vmem:[%s3393_s1 + $0x20] sm:$0xff]  ;;  %v47_v17 = vld [vmem:[%s3393_s1 + $0x28] sm:$0xff]  ;;  %s2448_s16 = sshll.u32 %s2971_s15, 4  ;;  %s2449_s16 = int_to_ptr.vmem [resolvable:$true] %s2448_s16 }
  0x17   :  { %2750 = vmatprep.subr.bf16.mxu0 %v2749_v6  ;;  %2754 = vmatprep.subr.bf16.mxu1 %v2753_v11  ;;  %v48_v18 = vld [vmem:[%s3393_s1 + $0x30] sm:$0xff]  ;;  %v49_v19 = vld [vmem:[%s3393_s1 + $0x38] sm:$0xff]  ;;  %v2460_v21 = vld [vmem:[%s3395_s3] ss:$0 sm:$0xff]  ;;  %s2963_s3 = smov 120   ;;  %p2940_p9 = scmp.lt.s32.totalorder %s2449_s16, %s2449_s16 }
  0x18   :  { %2756 = vmatpush3.bf16.msra.mxu1 %v2753_v11  ;;  %v3104_v25 = vld [vmem:[%s3397_s5] ss:$0 sm:$0xff]  ;;  %s2964_s5 = smov 112  }
  0x19   :  { %2758 = vmatprep.subr.bf16.mxu1 %v2757_v12 }
  0x1a   :  { %2752 = vmatpush3.bf16.msra.mxu0 %v2749_v6 }
  0x1b   :  { %2767 = vmatprep.subr.bf16.mxu0 %v2962_v20 }
  0x1c   :  { %2760 = vmatpush3.bf16.msra.mxu1 %v2757_v12 }
  0x1d   :  { %2588 = vmatmul.mubr.msk.f32.vlgmr.msra.gmra.mrb[0].mxu0 %vm61_vm0, %v43_v13  ;;  %2761 = vmatprep.subr.bf16.mxu1 %v2962_v20 }
  0x1e   :  { %2590 = vmatprep.mubr.msk.f32.mxu0 %vm61_vm0, %v44_v14 }
  0x1f   :  { %2608 = vmatmul.mubr.msk.f32.vlgmr.msra.gmra.mrb[0].mxu1 %vm61_vm0, %v43_v13 }
  0x20   :  { %2610 = vmatprep.mubr.msk.f32.mxu1 %vm61_vm0, %v44_v14 }
  0x21   :  { %2591 = vmatmul.mubr.msk.f32.gmra.mrb[2].mxu0 %vm61_vm0, %v45_v15 }
  0x22   :  { %2593 = vmatprep.mubr.msk.f32.mxu0 %vm61_vm0, %v46_v16 }
  0x23   :  { %2611 = vmatmul.mubr.msk.f32.gmra.mrb[2].mxu1 %vm61_vm0, %v45_v15 }
  0x24   :  { %2613 = vmatprep.mubr.msk.f32.mxu1 %vm61_vm0, %v46_v16 }
  0x25   :  { %2594 = vmatmul.mubr.msk.f32.gmra.mrb[4].mxu0 %vm61_vm0, %v47_v17 }
  0x26   :  { %2596 = vmatprep.mubr.msk.f32.mxu0 %vm61_vm0, %v48_v18 }
  0x27   :  { %2614 = vmatmul.mubr.msk.f32.gmra.mrb[4].mxu1 %vm61_vm0, %v47_v17 }
  0x28   :  { %2616 = vmatprep.mubr.msk.f32.mxu1 %vm61_vm0, %v48_v18 }
  0x29   :  { %2597 = vmatmul.mubr.msk.f32.gmra.mrb[6].mxu0 %vm61_vm0, %v49_v19 }
  0x2b   :  { %2617 = vmatmul.mubr.msk.f32.gmra.mrb[6].mxu1 %vm61_vm0, %v49_v19 }
  0xf0   :  { %v2589_v22 = vpop.f32.mrb[0].mxu0 }
  0xf1   :  { %v3099_v23 = vadd.f32 %v2589_v22, %v2460_v21  ;;  %v152_v24 = vpop.f32.mrb[1].mxu0 }
  0xf2   :  { %v3106_v26 = vadd.f32 %v2460_v21, %v152_v24  ;;  %v2609_v28 = vpop.f32.mrb[0].mxu1 }
  0xf3   :  { %v192_v27 = vsel %vm61_vm0, %v3099_v23, -inf  ;;  %v382_v31 = vadd.f32 %v2609_v28, %v3104_v25  ;;  %v376_v32 = vpop.f32.mrb[1].mxu1 }
  0xf4   :  { %v191_v29 = vsel %vm61_vm0, %v3106_v26, -inf  ;;  %v2592_v30 = vpop.f32.mrb[2].mxu0  ;;  %v377_v36 = vadd.f32 %v3104_v25, %v376_v32 }
  0xf5   :  { %v193_v33 = vmax.f32 %v191_v29, %v192_v27  ;;  %v3113_v34 = vadd.f32 %v2592_v30, %v2460_v21  ;;  %v162_v35 = vpop.f32.mrb[3].mxu0 }
  0xf6   :  { %v3116_v37 = vadd.f32 %v2460_v21, %v162_v35  ;;  %v2829_v40 = vpack.i.bf16 %v382_v31, %v377_v36  ;;  %v2612_v41 = vpop.f32.mrb[2].mxu1  ;;  %v2762_v46 = vpack.c.bf16 %v382_v31, %v377_v36 }
  0xf7   :  { %v194_v38 = vrot.slane %v193_v33, 4  ;;  %v201_v39 = vsel %vm61_vm0, %v3113_v34, -inf  ;;  %v3123_v44 = vadd.f32 %v2612_v41, %v3104_v25  ;;  %v386_v45 = vpop.f32.mrb[3].mxu1 }
  0xf8   :  { %v200_v42 = vsel %vm61_vm0, %v3116_v37, -inf  ;;  %v2595_v43 = vpop.f32.mrb[4].mxu0  ;;  %2830 = vrot.lane.b32.xlu0 %v2829_v40, %s2963_s3  ;;  %v3129_v51 = vadd.f32 %v3104_v25, %v386_v45  ;;  %2763 = vmatpush3.bf16.msra.mxu1 %v2762_v46 }
  0xf9   :  { %v195_v47 = vmax.f32 %v193_v33, %v194_v38  ;;  %v202_v48 = vmax.f32 %v200_v42, %v201_v39  ;;  %v3126_v49 = vadd.f32 %v2595_v43, %v2460_v21  ;;  %v172_v50 = vpop.f32.mrb[5].mxu0  ;;  %2764 = vmatprep.subr.bf16.mxu1 %v2962_v20 }
  0xfa   :  { %v3131_v52 = vadd.f32 %v2460_v21, %v172_v50  ;;  %v2615_v56 = vpop.f32.mrb[4].mxu1  ;;  %v2844_v57 = vpack.i.bf16 %v3123_v44, %v3129_v51  ;;  %v2765_v5 = vpack.c.bf16 %v3123_v44, %v3129_v51 }
  0xfb   :  { %v196_v53 = vrot.slane %v195_v47, 2  ;;  %v203_v54 = vrot.slane %v202_v48, 4  ;;  %v210_v55 = vsel %vm61_vm0, %v3126_v49, -inf  ;;  %v402_v59 = vadd.f32 %v2615_v56, %v3104_v25  ;;  %v396_v60 = vpop.f32.mrb[5].mxu1 }
  0xfc   :  { %v209_v58 = vsel %vm61_vm0, %v3131_v52, -inf  ;;  %v2598_v61 = vpop.f32.mrb[6].mxu0  ;;  %2835 = vrot.lane.b32.xlu0 %v2829_v40, %s2964_s5  ;;  %v397_v1 = vadd.f32 %v3104_v25, %v396_v60  ;;  %2845 = vrot.lane.b32.xlu1 %v2844_v57, %s2963_s3 }
  0xfd   :  { %v197_v62 = vmax.f32 %v195_v47, %v196_v53  ;;  %v204_v63 = vmax.f32 %v202_v48, %v203_v54  ;;  %v211_v0 = vmax.f32 %v209_v58, %v210_v55  ;;  %v182_v2 = vpop.f32.mrb[7].mxu0  ;;  %v3144_v3 = vadd.f32 %v2598_v61, %v2460_v21 }
  0xfe   :  { %v3146_v4 = vadd.f32 %v2460_v21, %v182_v2  ;;  %v2618_v9 = vpop.f32.mrb[6].mxu1  ;;  %v2859_v10 = vpack.i.bf16 %v402_v59, %v397_v1  ;;  %v2768_v13 = vpack.c.bf16 %v402_v59, %v397_v1 }
  0xff   :  { %v198_v6 = vrot.slane %v197_v62, 1  ;;  %v205_v7 = vrot.slane %v204_v63, 2  ;;  %v212_v8 = vrot.slane %v211_v0, 4  ;;  %v3151_v11 = vadd.f32 %v2618_v9, %v3104_v25  ;;  %v406_v12 = vpop.f32.mrb[7].mxu1 }
 0x100   :  { %2840 = vrot.lane.b32.xlu0 %v2829_v40, %s2965_s26  ;;  %v3155_v17 = vadd.f32 %v3104_v25, %v406_v12  ;;  %2850 = vrot.lane.b32.xlu1 %v2844_v57, %s2964_s5  ;;  %v219_v18 = vsel %vm61_vm0, %v3144_v3, -inf  ;;  %v218_v19 = vsel %vm61_vm0, %v3146_v4, -inf }
 0x101   :  { %v199_v14 = vmax.f32 %v197_v62, %v198_v6  ;;  %v206_v15 = vmax.f32 %v204_v63, %v205_v7  ;;  %v213_v16 = vmax.f32 %v211_v0, %v212_v8  ;;  %2769 = vmatpush3.bf16.msra.mxu0 %v2768_v13  ;;  %v220_v28 = vmax.f32 %v218_v19, %v219_v18 }
 0x102   :  { %2773 = vmatprep.subr.bf16.mxu0 %v2962_v20  ;;  %v2874_v25 = vpack.i.bf16 %v3151_v11, %v3155_v17 }
 0x103   :  { %v227_v21 = vsub.f32 %v3106_v26, %v199_v14  ;;  %v228_v22 = vsub.f32 %v3099_v23, %v199_v14  ;;  %v207_v24 = vrot.slane %v206_v15, 1  ;;  %v214_v27 = vrot.slane %v213_v16, 2 }
 0x104   :  { %2855 = vrot.lane.b32.xlu0 %v2844_v57, %s2965_s26  ;;  %2875 = vrot.lane.b32.xlu1 %v2874_v25, %s2963_s3  ;;  %v221_v33 = vrot.slane %v220_v28, 4  ;;  %v2771_v23 = vpack.c.bf16 %v3151_v11, %v3155_v17 }
 0x105   :  { %v235_v29 = vmul.f32 1.442695, %v227_v21  ;;  %v237_v30 = vmul.f32 1.442695, %v228_v22  ;;  %v208_v31 = vmax.f32 %v206_v15, %v207_v24  ;;  %v215_v32 = vmax.f32 %v213_v16, %v214_v27 }
 0x106   :  { %v222_v38 = vmax.f32 %v220_v28, %v221_v33 }
 0x107   :  { %2889 = vpow2.f32 %v235_v29  ;;  %v229_v26 = vsub.f32 %v3116_v37, %v208_v31  ;;  %v230_v35 = vsub.f32 %v3113_v34, %v208_v31  ;;  %v216_v36 = vrot.slane %v215_v32, 1 }
 0x108   :  { %2891 = vpow2.f32 %v237_v30  ;;  %2860 = vrot.lane.b32.xlu0 %v2859_v10, %s2963_s3  ;;  %2880 = vrot.lane.b32.xlu1 %v2874_v25, %s2964_s5  ;;  %v223_v42 = vrot.slane %v222_v38, 2 }
 0x109   :  { %v239_v39 = vmul.f32 1.442695, %v229_v26  ;;  %v241_v40 = vmul.f32 1.442695, %v230_v35  ;;  %v217_v41 = vmax.f32 %v215_v32, %v216_v36 }
 0x10a   :  { %v224_v37 = vmax.f32 %v222_v38, %v223_v42 }
 0x10b   :  { %2893 = vpow2.f32 %v239_v39  ;;  %v231_v43 = vsub.f32 %v3131_v52, %v217_v41  ;;  %v232_v45 = vsub.f32 %v3126_v49, %v217_v41 }
 0x10c   :  { %2895 = vpow2.f32 %v241_v40  ;;  %2865 = vrot.lane.b32.xlu0 %v2859_v10, %s2964_s5  ;;  %2885 = vrot.lane.b32.xlu1 %v2874_v25, %s2965_s26  ;;  %v225_v47 = vrot.slane %v224_v37, 1 }
 0x10d   :  { %v243_v46 = vmul.f32 1.442695, %v231_v43  ;;  %v245_v34 = vmul.f32 1.442695, %v232_v45 }
 0x10e   :  { %v226_v48 = vmax.f32 %v224_v37, %v225_v47 }
 0x10f   :  { %2897 = vpow2.f32 %v243_v46 }
 0x110   :  { %2899 = vpow2.f32 %v245_v34  ;;  %2870 = vrot.lane.b32.xlu0 %v2859_v10, %s2965_s26  ;;  %v233_v49 = vsub.f32 %v3146_v4, %v226_v48  ;;  %v234_v54 = vsub.f32 %v3144_v3, %v226_v48 }
 0x111   :  { %v2890_v50 = vpop.eup %2889 }
 0x112   :  { %v2892_v53 = vpop.eup %2891  ;;  %v251_v52 = vsel %vm61_vm0, %v2890_v50, 0.0  ;;  %v247_v57 = vmul.f32 1.442695, %v233_v49  ;;  %v249_v58 = vmul.f32 1.442695, %v234_v54  ;;  %v2967_v49 = vmov 0.0  }
 0x113   :  { %v252_v55 = vsel %vm61_vm0, %v2892_v53, 0.0  ;;  %2623 = vmatprep.mubr.msk.f32.mxu1 %vm2966_vm1, %v2967_v49  ;;  %2637 = vmatprep.mubr.msk.f32.mxu0 %vm2966_vm1, %v2967_v49 }
 0x114   :  { %v253_v56 = vadd.f32 %v252_v55, %v251_v52  ;;  %2901 = vpow2.f32 %v247_v57 }
 0x115   :  { %v2894_v59 = vpop.eup %2893  ;;  %2903 = vpow2.f32 %v249_v58 }
 0x116   :  { %v2896_v60 = vpop.eup %2895  ;;  %v254_v61 = vrot.slane %v253_v56, 4  ;;  %v260_v62 = vsel %vm61_vm0, %v2894_v59, 0.0 }
 0x117   :  { %v261_v63 = vsel %vm61_vm0, %v2896_v60, 0.0 }
 0x118   :  { %v255_v0 = vadd.f32 %v254_v61, %v253_v56  ;;  %v262_v1 = vadd.f32 %v261_v63, %v260_v62 }
 0x119   :  { %v2898_v2 = vpop.eup %2897 }
 0x11a   :  { %v2900_v4 = vpop.eup %2899  ;;  %v256_v6 = vrot.slane %v255_v0, 2  ;;  %v263_v3 = vrot.slane %v262_v1, 4  ;;  %v269_v7 = vsel %vm61_vm0, %v2898_v2, 0.0 }
 0x11b   :  { %v270_v8 = vsel %vm61_vm0, %v2900_v4, 0.0 }
 0x11c   :  { %v257_v9 = vadd.f32 %v256_v6, %v255_v0  ;;  %v264_v10 = vadd.f32 %v263_v3, %v262_v1  ;;  %v271_v12 = vadd.f32 %v270_v8, %v269_v7 }
 0x11e   :  { %v265_v13 = vrot.slane %v264_v10, 2  ;;  %v272_v14 = vrot.slane %v271_v12, 4  ;;  %v258_v15 = vrot.slane %v257_v9, 1  ;;  %v2902_v16 = vpop.eup %2901 }
 0x11f   :  { %v2904_v22 = vpop.eup %2903  ;;  %v278_v24 = vsel %vm61_vm0, %v2902_v16, 0.0 }
 0x120   :  { %v266_v18 = vadd.f32 %v265_v13, %v264_v10  ;;  %v273_v19 = vadd.f32 %v272_v14, %v271_v12  ;;  %v259_v21 = vadd.f32 %v258_v15, %v257_v9  ;;  %v279_v25 = vsel %vm61_vm0, %v2904_v22, 0.0 }
 0x121   :  { %v280_v29 = vadd.f32 %v279_v25, %v278_v24 }
 0x122   :  { %v274_v27 = vrot.slane %v273_v19, 2  ;;  %2905 = vrcp.f32 %v259_v21  ;;  %v267_v28 = vrot.slane %v266_v18, 1 }
 0x123   :  { %v281_v32 = vrot.slane %v280_v29, 4 }
 0x124   :  { %v275_v30 = vadd.f32 %v274_v27, %v273_v19  ;;  %v268_v31 = vadd.f32 %v267_v28, %v266_v18 }
 0x125   :  { %v282_v26 = vadd.f32 %v281_v32, %v280_v29 }
 0x126   :  { %2907 = vrcp.f32 %v268_v31  ;;  %v276_v33 = vrot.slane %v275_v30, 1 }
 0x127   :  { %v283_v36 = vrot.slane %v282_v26, 2 }
 0x128   :  { %v277_v35 = vadd.f32 %v276_v33, %v275_v30 }
 0x129   :  { %v284_v38 = vadd.f32 %v283_v36, %v282_v26 }
 0x12a   :  { %2909 = vrcp.f32 %v277_v35 }
 0x12b   :  { %v285_v42 = vrot.slane %v284_v38, 1 }
 0x12c   :  { %v2906_v39 = vpop.eup %2905 }
 0x12d   :  { %v292_v40 = vmul.f32 %v2906_v39, %v2892_v53  ;;  %v291_v41 = vmul.f32 %v2906_v39, %v2890_v50  ;;  %v286_v43 = vadd.f32 %v285_v42, %v284_v38 }
 0x12f   :  { %840 = vrot.lane.b32.xlu1 %v292_v40, %s2963_s3  ;;  %838 = vrot.lane.b32.xlu0 %v291_v41, %s2963_s3  ;;  %2911 = vrcp.f32 %v286_v43 }
 0x130   :  { %v2908_v45 = vpop.eup %2907 }
 0x131   :  { %v294_v37 = vmul.f32 %v2908_v45, %v2896_v60  ;;  %v293_v46 = vmul.f32 %v2908_v45, %v2894_v59 }
 0x133   :  { %961 = vrot.lane.b32.xlu1 %v294_v37, %s2963_s3  ;;  %1320 = vrot.lane.b32.xlu0 %v291_v41, %s2964_s5 }
 0x134   :  { %v2910_v34 = vpop.eup %2909 }
 0x135   :  { %v295_v47 = vmul.f32 %v2910_v34, %v2898_v2  ;;  %v296_v48 = vmul.f32 %v2910_v34, %v2900_v4 }
 0x137   :  { %1437 = vrot.lane.b32.xlu1 %v293_v46, %s2964_s5  ;;  %1322 = vrot.lane.b32.xlu0 %v292_v40, %s2964_s5 }
 0x139   :  { %v2912_v50 = vpop.eup %2911 }
 0x13a   :  { %v297_v53 = vmul.f32 %v2912_v50, %v2902_v16  ;;  %v298_v52 = vmul.f32 %v2912_v50, %v2904_v22 }
 0x13b   :  { %1439 = vrot.lane.b32.xlu1 %v294_v37, %s2964_s5  ;;  %1788 = vrot.lane.b32.xlu0 %v291_v41, %s2965_s26 }
 0x13f   :  { %1905 = vrot.lane.b32.xlu1 %v293_v46, %s2965_s26  ;;  %1790 = vrot.lane.b32.xlu0 %v292_v40, %s2965_s26 }
 0x143   :  { %1907 = vrot.lane.b32.xlu1 %v294_v37, %s2965_s26  ;;  %959 = vrot.lane.b32.xlu0 %v293_v46, %s2963_s3 }
 0x147   :  { %1080 = vrot.lane.b32.xlu0 %v295_v47, %s2963_s3 }
 0x14b   :  { %1082 = vrot.lane.b32.xlu0 %v296_v48, %s2963_s3 }
 0x14f   :  { %1554 = vrot.lane.b32.xlu0 %v295_v47, %s2964_s5 }
 0x153   :  { %1556 = vrot.lane.b32.xlu0 %v296_v48, %s2964_s5 }
 0x157   :  { %2022 = vrot.lane.b32.xlu0 %v295_v47, %s2965_s26 }
 0x15b   :  { %2024 = vrot.lane.b32.xlu0 %v296_v48, %s2965_s26 }
 0x16a   :  { %v3212_v54 = vpop.permute.xlu0 %2830 }
 0x16b   :  { %v2833_v44 = vunpack.i.h.bf16 %v3212_v54  ;;  %v2832_v51 = vunpack.i.l.bf16 %v3212_v54 }
 0x16c   :  { %415 = vxpose.xlu1.b32.start [1/2] (short) (narrow) %v291_v41, 8 }
 0x16d   :  { %v2774_v28 = vpack.c.bf16 %v2833_v44, %v2832_v51 }
 0x16e   :  { %v3214_v55 = vpop.permute.xlu0 %2835  ;;  %v3218_v57 = vpop.permute.xlu1 %2845 }
 0x16f   :  { %v2848_v17 = vunpack.i.h.bf16 %v3218_v57  ;;  %v2837_v34 = vunpack.i.l.bf16 %v3214_v55 }
 0x170   :  { %416 = vxpose.xlu1.b32.end [2/2] (short) (narrow) %v292_v40, 8 }
 0x172   :  { %v3216_v56 = vpop.permute.xlu0 %2840  ;;  %v3223_v59 = vpop.permute.xlu1 %2850 }
 0x176   :  { %v3220_v58 = vpop.permute.xlu0 %2855  ;;  %v3228_v61 = vpop.permute.xlu1 %2875 }
 0x177   :  { %v2878_v41 = vunpack.i.h.bf16 %v3228_v61  ;;  %v2877_v42 = vunpack.i.l.bf16 %v3228_v61 }
 0x179   :  { %521 = vxpose.xlu0.b32.start [1/2] (short) (narrow) %v293_v46, 8  ;;  %v2783_v43 = vpack.c.bf16 %v2878_v41, %v2877_v42  ;;  %v2838_v46 = vunpack.i.h.bf16 %v3214_v55  ;;  %v2843_v55 = vunpack.i.h.bf16 %v3216_v56 }
 0x17a   :  { %v3225_v60 = vpop.permute.xlu0 %2860  ;;  %v3234_v63 = vpop.permute.xlu1 %2880 }
 0x17b   :  { %v2863_v36 = vunpack.i.h.bf16 %v3225_v60  ;;  %v2862_v38 = vunpack.i.l.bf16 %v3225_v60  ;;  %v2842_v60 = vunpack.i.l.bf16 %v3216_v56  ;;  %v2853_v56 = vunpack.i.h.bf16 %v3223_v59 }
 0x17d   :  { %522 = vxpose.xlu0.b32.end [2/2] (short) (narrow) %v294_v37, 8  ;;  %v2780_v39 = vpack.c.bf16 %v2863_v36, %v2862_v38  ;;  %v2798_v61 = vpack.c.bf16 %v2843_v55, %v2842_v60  ;;  %v2325_v38 = vld [vmem:[%s3398_s6 + $0x10] sm:$0xff] }
 0x17e   :  { %v3231_v62 = vpop.permute.xlu0 %2865  ;;  %v3239_v1 = vpop.permute.xlu1 %2885 }
 0x17f   :  { %v2868_v50 = vunpack.i.h.bf16 %v3231_v62 }
 0x181   :  { %626 = vxpose.xlu0.b32.start [1/2] (short) (narrow) %v295_v47, 8 }
 0x182   :  { %v3236_v0 = vpop.permute.xlu0 %2870 }
 0x185   :  { %627 = vxpose.xlu0.b32.end [2/2] (short) (narrow) %v296_v48, 8  ;;  %v2786_v48 = vpack.c.bf16 %v2838_v46, %v2837_v34 }
 0x189   :  { %731 = vxpose.xlu0.b32.start [1/2] (short) (narrow) %v297_v53, 8 }
 0x18d   :  { %732 = vxpose.xlu0.b32.end [2/2] (short) (narrow) %v298_v52, 8 }
 0x18e   :  { %1201 = vrot.lane.b32.xlu1 %v297_v53, %s2963_s3 }
 0x192   :  { %1203 = vrot.lane.b32.xlu1 %v298_v52, %s2963_s3 }
 0x196   :  { %1671 = vrot.lane.b32.xlu1 %v297_v53, %s2964_s5 }
 0x19a   :  { %1673 = vrot.lane.b32.xlu1 %v298_v52, %s2964_s5 }
 0x19e   :  { %2139 = vrot.lane.b32.xlu1 %v297_v53, %s2965_s26  ;;  %v2867_v53 = vunpack.i.l.bf16 %v3231_v62  ;;  %v2873_v62 = vunpack.i.h.bf16 %v3236_v0 }
 0x1a0   :  { %v2792_v54 = vpack.c.bf16 %v2868_v50, %v2867_v53 }
 0x1a1   :  { %v839_v2 = vpop.permute.xlu0 %838  ;;  %v841_v4 = vpop.permute.xlu1 %840 }
 0x1a2   :  { %2141 = vrot.lane.b32.xlu1 %v298_v52, %s2965_s26  ;;  %844 = vxpose.xlu0.b32.start [1/2] (short) (narrow) %v839_v2, 8  ;;  %v2872_v2 = vunpack.i.l.bf16 %v3236_v0  ;;  %v2852_v0 = vunpack.i.l.bf16 %v3223_v59 }
 0x1a5   :  { %v1321_v6 = vpop.permute.xlu0 %1320  ;;  %v962_v10 = vpop.permute.xlu1 %961 }
 0x1a6   :  { %845 = vxpose.xlu0.b32.end [2/2] (short) (narrow) %v841_v4, 8 }
 0x1a9   :  { %v1323_v3 = vpop.permute.xlu0 %1322  ;;  %v1438_v12 = vpop.permute.xlu1 %1437 }
 0x1ad   :  { %v1789_v7 = vpop.permute.xlu0 %1788  ;;  %v1440_v14 = vpop.permute.xlu1 %1439 }
 0x1b1   :  { %v1791_v8 = vpop.permute.xlu0 %1790  ;;  %v1906_v16 = vpop.permute.xlu1 %1905 }
 0x1b5   :  { %v960_v9 = vpop.permute.xlu0 %959  ;;  %v1908_v19 = vpop.permute.xlu1 %1907 }
 0x1b6   :  { %965 = vxpose.xlu0.b32.start [1/2] (short) (narrow) %v960_v9, 8 }
 0x1b9   :  { %v1081_v13 = vpop.permute.xlu0 %1080 }
 0x1ba   :  { %966 = vxpose.xlu0.b32.end [2/2] (short) (narrow) %v962_v10, 8  ;;  %v2858_v10 = vunpack.i.h.bf16 %v3220_v58 }
 0x1bd   :  { %v1083_v15 = vpop.permute.xlu0 %1082 }
 0x1be   :  { %1326 = vxpose.xlu0.b32.start [1/2] (short) (narrow) %v1321_v6, 8  ;;  %v2804_v6 = vpack.c.bf16 %v2873_v62, %v2872_v2 }
 0x1c1   :  { %v1555_v18 = vpop.permute.xlu0 %1554 }
 0x1c2   :  { %1327 = vxpose.xlu0.b32.end [2/2] (short) (narrow) %v1323_v3, 8  ;;  %v2789_v3 = vpack.c.bf16 %v2853_v56, %v2852_v0  ;;  %v2318_v0 = vld [vmem:[#allocation2] sm:$0xff] }
 0x1c5   :  { %v1557_v21 = vpop.permute.xlu0 %1556 }
 0x1c6   :  { %1443 = vxpose.xlu0.b32.start [1/2] (short) (narrow) %v1438_v12, 8  ;;  %v2857_v12 = vunpack.i.l.bf16 %v3220_v58 }
 0x1c8   :  { %v2801_v59 = vpack.c.bf16 %v2858_v10, %v2857_v12 }
 0x1c9   :  { %v2023_v24 = vpop.permute.xlu0 %2022 }
 0x1ca   :  { %1444 = vxpose.xlu0.b32.end [2/2] (short) (narrow) %v1440_v14, 8  ;;  %v2887_v14 = vunpack.i.l.bf16 %v3239_v1 }
 0x1cb   :  { %1086 = vxpose.xlu1.b32.start [1/2] (short) (narrow) %v1081_v13, 8 }
 0x1cd   :  { %v2025_v27 = vpop.permute.xlu0 %2024 }
 0x1ce   :  { %1794 = vxpose.xlu0.b32.start [1/2] (short) (narrow) %v1789_v7, 8  ;;  %v2883_v7 = vunpack.i.h.bf16 %v3234_v63 }
 0x1cf   :  { %1087 = vxpose.xlu1.b32.end [2/2] (short) (narrow) %v1083_v15, 8 }
 0x1d2   :  { %1795 = vxpose.xlu0.b32.end [2/2] (short) (narrow) %v1791_v8, 8  ;;  %v2882_v8 = vunpack.i.l.bf16 %v3234_v63  ;;  %v2888_v63 = vunpack.i.h.bf16 %v3239_v1 }
 0x1d3   :  { %1911 = vxpose.xlu1.b32.start [1/2] (short) (narrow) %v1906_v16, 8 }
 0x1d4   :  { %v2795_v13 = vpack.c.bf16 %v2883_v7, %v2882_v8  ;;  %v2807_v58 = vpack.c.bf16 %v2888_v63, %v2887_v14 }
 0x1d6   :  { %1560 = vxpose.xlu0.b32.start [1/2] (short) (narrow) %v1555_v18, 8 }
 0x1d7   :  { %1912 = vxpose.xlu1.b32.end [2/2] (short) (narrow) %v1908_v19, 8 }
 0x1da   :  { %1561 = vxpose.xlu0.b32.end [2/2] (short) (narrow) %v1557_v21, 8 }
 0x1ec   :  { %v431_v22 = vpop.trf.xlu1 }
 0x1ed   :  { %2624 = vmatmul.mubr.msk.f32.vlgmr.msra.gmra.mrb[8].mxu1 %vm447_vm2, %v431_v22 }
 0x1ee   :  { %2766 = vmatpush3.bf16.msra.mxu1 %v2765_v5  ;;  %2630 = vmatprep.mubr.msk.f32.mxu1 %vm2966_vm1, %v2967_v49 }
 0x1ef   :  { %2770 = vmatprep.subr.bf16.mxu1 %v2962_v20 }
 0x1f9   :  { %v537_v25 = vpop.trf.xlu0 }
 0x1fa   :  { %2631 = vmatmul.mubr.msk.f32.vlgmr.msra.gmra.mrb[10].mxu1 %vm447_vm2, %v537_v25 }
 0x1fb   :  { %2772 = vmatpush3.bf16.msra.mxu1 %v2771_v23  ;;  %2644 = vmatprep.mubr.msk.f32.mxu1 %vm2966_vm1, %v2967_v49  ;;  %v2847_v23 = vunpack.i.l.bf16 %v3218_v57 }
 0x1fc   :  { %2776 = vmatprep.subr.bf16.mxu1 %v2962_v20 }
 0x1fd   :  { %v2777_v31 = vpack.c.bf16 %v2848_v17, %v2847_v23 }
 0x200   :  { %v1202_v5 = vpop.permute.xlu1 %1201 }
 0x201   :  { %1207 = vxpose.xlu0.b32.start [1/2] (short) (narrow) %v1202_v5, 8  ;;  %v642_v29 = vpop.trf.xlu0 }
 0x202   :  { %2638 = vmatmul.mubr.msk.f32.vlgmr.msra.gmra.mrb[8].mxu0 %vm447_vm2, %v642_v29 }
 0x203   :  { %2775 = vmatpush3.bf16.msra.mxu0 %v2774_v28  ;;  %2651 = vmatprep.mubr.msk.f32.mxu0 %vm2966_vm1, %v2967_v49 }
 0x204   :  { %v1204_v11 = vpop.permute.xlu1 %1203  ;;  %2779 = vmatprep.subr.bf16.mxu0 %v2962_v20 }
 0x205   :  { %1208 = vxpose.xlu0.b32.end [2/2] (short) (narrow) %v1204_v11, 8 }
 0x208   :  { %v1672_v30 = vpop.permute.xlu1 %1671 }
 0x209   :  { %1677 = vxpose.xlu0.b32.start [1/2] (short) (narrow) %v1672_v30, 8  ;;  %v747_v32 = vpop.trf.xlu0 }
 0x20a   :  { %2645 = vmatmul.mubr.msk.f32.vlgmr.msra.gmra.mrb[12].mxu1 %vm447_vm2, %v747_v32 }
 0x20b   :  { %2778 = vmatpush3.bf16.msra.mxu1 %v2777_v31  ;;  %2658 = vmatprep.mubr.msk.f32.mxu1 %vm2966_vm1, %v2967_v49 }
 0x20c   :  { %v1674_v33 = vpop.permute.xlu1 %1673  ;;  %2782 = vmatprep.subr.bf16.mxu1 %v2962_v20 }
 0x20d   :  { %1678 = vxpose.xlu0.b32.end [2/2] (short) (narrow) %v1674_v33, 8 }
 0x210   :  { %v2140_v26 = vpop.permute.xlu1 %2139 }
 0x211   :  { %2145 = vxpose.xlu1.b32.start [1/2] (short) (narrow) %v2140_v26, 8  ;;  %2028 = vxpose.xlu0.b32.start [1/2] (short) (narrow) %v2023_v24, 8  ;;  %v2323_v26 = vld [vmem:[%s3398_s6] sm:$0xff] }
 0x214   :  { %v2142_v35 = vpop.permute.xlu1 %2141 }
 0x215   :  { %2146 = vxpose.xlu1.b32.end [2/2] (short) (narrow) %v2142_v35, 8  ;;  %2029 = vxpose.xlu0.b32.end [2/2] (short) (narrow) %v2025_v27, 8  ;;  %v2324_v35 = vld [vmem:[%s3398_s6 + $0x8] sm:$0xff] }
 0x216   :  { %v2809_v36 = vpack.c.bf16 %v2324_v35, %v2323_v26 }
 0x222   :  { %v860_v40 = vpop.trf.xlu0 }
 0x223   :  { %2652 = vmatmul.mubr.msk.f32.vlgmr.msra.gmra.mrb[10].mxu0 %vm447_vm2, %v860_v40 }
 0x224   :  { %2781 = vmatpush3.bf16.msra.mxu0 %v2780_v39  ;;  %2665 = vmatprep.mubr.msk.f32.mxu0 %vm2966_vm1, %v2967_v49  ;;  %v2326_v39 = vld [vmem:[%s3398_s6 + $0x18] sm:$0xff] }
 0x225   :  { %2785 = vmatprep.subr.bf16.mxu0 %v2962_v20  ;;  %v2813_v40 = vpack.c.bf16 %v2326_v39, %v2325_v38 }
 0x236   :  { %v981_v45 = vpop.trf.xlu0 }
 0x237   :  { %2659 = vmatmul.mubr.msk.f32.vlgmr.msra.gmra.mrb[14].mxu1 %vm447_vm2, %v981_v45 }
 0x238   :  { %2784 = vmatpush3.bf16.msra.mxu1 %v2783_v43  ;;  %2672 = vmatprep.mubr.msk.f32.mxu1 %vm2966_vm1, %v2967_v49 }
 0x239   :  { %2788 = vmatprep.subr.bf16.mxu1 %v2962_v20 }
 0x23e   :  { %v1342_v37 = vpop.trf.xlu0 }
 0x246   :  { %v1459_v47 = vpop.trf.xlu0 }
 0x24b   :  { %v1102_v52 = vpop.trf.xlu1 }
 0x24c   :  { %2666 = vmatmul.mubr.msk.f32.vlgmr.msra.gmra.mrb[12].mxu0 %vm447_vm2, %v1102_v52 }
 0x24d   :  { %2787 = vmatpush3.bf16.msra.mxu0 %v2786_v48  ;;  %2679 = vmatprep.mubr.msk.f32.mxu0 %vm2966_vm1, %v2967_v49 }
 0x24e   :  { %2791 = vmatprep.subr.bf16.mxu0 %v2962_v20  ;;  %v1810_v57 = vpop.trf.xlu0 }
 0x250   :  { %2680 = vmatmul.mubr.msk.f32.vlgmr.msra.gmra.mrb[14].mxu0 %vm447_vm2, %v1342_v37 }
 0x251   :  { %2793 = vmatpush3.bf16.msra.mxu0 %v2792_v54  ;;  %2693 = vmatprep.mubr.msk.f32.mxu0 %vm2966_vm1, %v2967_v49 }
 0x252   :  { %2797 = vmatprep.subr.bf16.mxu0 %v2962_v20 }
 0x253   :  { %v1927_v16 = vpop.trf.xlu1 }
 0x256   :  { %v1576_v4 = vpop.trf.xlu0 }
 0x257   :  { %2694 = vmatmul.mubr.msk.f32.vlgmr.msra.gmra.mrb[16].mxu0 %vm447_vm2, %v1576_v4 }
 0x258   :  { %2799 = vmatpush3.bf16.msra.mxu0 %v2798_v61  ;;  %2707 = vmatprep.mubr.msk.f32.mxu0 %vm2966_vm1, %v2967_v49 }
 0x259   :  { %2803 = vmatprep.subr.bf16.mxu0 %v2962_v20 }
 0x25b   :  { %2708 = vmatmul.mubr.msk.f32.vlgmr.msra.gmra.mrb[18].mxu0 %vm447_vm2, %v1810_v57 }
 0x25c   :  { %2805 = vmatpush3.bf16.msra.mxu0 %v2804_v6  ;;  %2721 = vmatprep.mubr.msk.f32.mxu0 %vm2966_vm1, %v2967_v49 }
 0x25d   :  { %2810 = vmatprep.subr.bf16.mxu0 %v2809_v36 }
 0x281   :  { %v1223_v9 = vpop.trf.xlu0 }
 0x282   :  { %2673 = vmatmul.mubr.msk.f32.vlgmr.msra.gmra.mrb[16].mxu1 %vm447_vm2, %v1223_v9 }
 0x283   :  { %2790 = vmatpush3.bf16.msra.mxu1 %v2789_v3  ;;  %2686 = vmatprep.mubr.msk.f32.mxu1 %vm2966_vm1, %v2967_v49 }
 0x284   :  { %2794 = vmatprep.subr.bf16.mxu1 %v2962_v20 }
 0x286   :  { %2687 = vmatmul.mubr.msk.f32.vlgmr.msra.gmra.mrb[18].mxu1 %vm447_vm2, %v1459_v47 }
 0x287   :  { %2796 = vmatpush3.bf16.msra.mxu1 %v2795_v13  ;;  %2700 = vmatprep.mubr.msk.f32.mxu1 %vm2966_vm1, %v2967_v49 }
 0x288   :  { %2800 = vmatprep.subr.bf16.mxu1 %v2962_v20 }
 0x289   :  { %v1693_v15 = vpop.trf.xlu0 }
 0x28a   :  { %2701 = vmatmul.mubr.msk.f32.vlgmr.msra.gmra.mrb[20].mxu1 %vm447_vm2, %v1693_v15 }
 0x28b   :  { %2802 = vmatpush3.bf16.msra.mxu1 %v2801_v59  ;;  %2714 = vmatprep.mubr.msk.f32.mxu1 %vm2966_vm1, %v2967_v49 }
 0x28c   :  { %2806 = vmatprep.subr.bf16.mxu1 %v2962_v20 }
 0x28e   :  { %2715 = vmatmul.mubr.msk.f32.vlgmr.msra.gmra.mrb[22].mxu1 %vm447_vm2, %v1927_v16 }
 0x28f   :  { %2808 = vmatpush3.bf16.msra.mxu1 %v2807_v58  ;;  %2728 = vmatprep.mubr.msk.f32.mxu1 %vm2966_vm1, %v2967_v49 }
 0x291   :  { %v2161_v18 = vpop.trf.xlu1  ;;  %v2044_v19 = vpop.trf.xlu0 }
 0x292   :  { %2722 = vmatmul.mubr.msk.f32.vlgmr.msra.gmra.mrb[20].mxu0 %vm447_vm2, %v2044_v19  ;;  %2729 = vmatmul.mubr.msk.f32.vlgmr.msra.gmra.mrb[24].mxu1 %vm447_vm2, %v2161_v18 }
 0x293   :  { %2812 = vmatpush3.bf16.msra.mxu0 %v2809_v36 }
 0x294   :  { %2814 = vmatprep.subr.bf16.mxu0 %v2813_v40 }
 0x297   :  { %2816 = vmatpush3.bf16.msra.mxu0 %v2813_v40 }
 0x2c0   :  { %v3328_v1 = vpop.f32.mrb[8].mxu1 }
 0x2c1   :  { %v2625_v21 = vpop.f32.mrb[9].mxu1 }
 0x2cd   :  { %v3330_v22 = vpop.f32.mrb[10].mxu1 }
 0x2ce   :  { %v2632_v24 = vpop.f32.mrb[11].mxu1 }
 0x2cf   :  { %v2494_v24 = vld [vmem:[%s3399_s7] ss:$0 sm:$0xff]  ;;  %s2935_s7 = scalar_lea.vmem %s2449_s16, 512 }
 0x2d0   :  { %p2936_p8 = scmp.ne.s32.totalorder %s2449_s16, %s2935_s7  ;;  %p2941_p10 = scmp.lt.s32.totalorder %s2935_s7, %s2935_s7 }
 0x2d2   :  { %p2942_p11 = por %p2941_p10, %p2940_p9 }
 0x2d4   :  { %p2943_p12 = pnand %p2942_p11, %p2936_p8 }
 0x2d5   :  { %v3332_v20 = vpop.f32.mrb[8].mxu0 }
 0x2d6   :  { %v2639_v27 = vpop.f32.mrb[9].mxu0 }
 0x2dd   :  { %v3334_v25 = vpop.f32.mrb[12].mxu1 }
 0x2de   :  { %v2646_v44 = vpop.f32.mrb[13].mxu1 }
 0x2f6   :  { %v953_v51 = vpop.f32.mrb[10].mxu0 }
 0x2f7   :  { %2260 = vrot.lane.b32.xlu0 %v953_v51, %s2968_s27  ;;  %v2653_v49 = vpop.f32.mrb[11].mxu0 }
 0x30a   :  { %v1074_v5 = vpop.f32.mrb[14].mxu1 }
 0x30b   :  { %2262 = vrot.lane.b32.xlu1 %v1074_v5, %s2968_s27  ;;  %v2660_v28 = vpop.f32.mrb[15].mxu1 }
 0x31f   :  { %v1195_v29 = vpop.f32.mrb[12].mxu0 }
 0x320   :  { %2264 = vrot.lane.b32.xlu1 %v1195_v29, %s2968_s27  ;;  %v2667_v11 = vpop.f32.mrb[13].mxu0 }
 0x323   :  { %v1433_v17 = vpop.f32.mrb[14].mxu0 }
 0x324   :  { %v2681_v23 = vpop.f32.mrb[15].mxu0 }
 0x32a   :  { %v1667_v30 = vpop.f32.mrb[16].mxu0 }
 0x32b   :  { %v2695_v31 = vpop.f32.mrb[17].mxu0 }
 0x32e   :  { %v1901_v32 = vpop.f32.mrb[18].mxu0 }
 0x32f   :  { %v2709_v33 = vpop.f32.mrb[19].mxu0 }
 0x355   :  { %v1316_v41 = vpop.f32.mrb[16].mxu1 }
 0x356   :  { %2266 = vrot.lane.b32.xlu1 %v1316_v41, %s2968_s27  ;;  %v2674_v42 = vpop.f32.mrb[17].mxu1 }
 0x359   :  { %v1550_v43 = vpop.f32.mrb[18].mxu1 }
 0x35a   :  { %2276 = vrot.lane.b32.xlu1 %v1433_v17, %s2969_s13  ;;  %2278 = vrot.lane.b32.xlu0 %v1550_v43, %s2969_s13  ;;  %v2688_v45 = vpop.f32.mrb[19].mxu1 }
 0x35d   :  { %v1784_v37 = vpop.f32.mrb[20].mxu1 }
 0x35e   :  { %2280 = vrot.lane.b32.xlu1 %v1667_v30, %s2969_s13  ;;  %2282 = vrot.lane.b32.xlu0 %v1784_v37, %s2969_s13  ;;  %v2702_v46 = vpop.f32.mrb[21].mxu1 }
 0x361   :  { %v2018_v34 = vpop.f32.mrb[22].mxu1 }
 0x362   :  { %2292 = vrot.lane.b32.xlu1 %v1901_v32, %s2970_s14  ;;  %2294 = vrot.lane.b32.xlu0 %v2018_v34, %s2970_s14  ;;  %v2716_v47 = vpop.f32.mrb[23].mxu1 }
 0x365   :  { %v2135_v48 = vpop.f32.mrb[20].mxu0  ;;  %v2252_v50 = vpop.f32.mrb[24].mxu1 }
 0x366   :  { %2298 = vrot.lane.b32.xlu0 %v2252_v50, %s2970_s14  ;;  %v2730_v53 = vpop.f32.mrb[25].mxu1  ;;  %2296 = vrot.lane.b32.xlu1 %v2135_v48, %s2970_s14  ;;  %v2723_v52 = vpop.f32.mrb[21].mxu0 }
 0x369   :  { %v2261_v55 = vpop.permute.xlu0 %2260 }
 0x36a   :  { %v2305_v6 = vsel %vm2304_vm3, %v3328_v1, %v2261_v55 }
 0x37d   :  { %v2263_v54 = vpop.permute.xlu1 %2262 }
 0x37e   :  { %v2306_v56 = vsel %vm2304_vm3, %v3330_v22, %v2263_v54 }
 0x392   :  { %v2265_v57 = vpop.permute.xlu1 %2264 }
 0x393   :  { %v2307_v63 = vsel %vm2304_vm3, %v3332_v20, %v2265_v57 }
 0x3c8   :  { %v2267_v60 = vpop.permute.xlu1 %2266 }
 0x3c9   :  { %v2308_v14 = vsel %vm2304_vm3, %v3334_v25, %v2267_v60 }
 0x3cc   :  { %v2277_v61 = vpop.permute.xlu1 %2276  ;;  %v2279_v62 = vpop.permute.xlu0 %2278 }
 0x3cd   :  { %v2309_v3 = vsel %vm447_vm2, %v2305_v6, %v2277_v61  ;;  %v2310_v7 = vsel %vm447_vm2, %v2306_v56, %v2279_v62 }
 0x3d0   :  { %v2281_v2 = vpop.permute.xlu1 %2280  ;;  %v2283_v4 = vpop.permute.xlu0 %2282 }
 0x3d1   :  { %v2311_v15 = vsel %vm447_vm2, %v2307_v63, %v2281_v2  ;;  %v2312_v16 = vsel %vm447_vm2, %v2308_v14, %v2283_v4 }
 0x3d4   :  { %v2293_v8 = vpop.permute.xlu1 %2292  ;;  %v2295_v9 = vpop.permute.xlu0 %2294 }
 0x3d5   :  { %v2314_v10 = vsel %vm2313_vm4, %v2309_v3, %v2293_v8  ;;  %v2315_v12 = vsel %vm2313_vm4, %v2310_v7, %v2295_v9 }
 0x3d6   :  { %v2319_v13 = vadd.f32 %v2318_v0, %v2314_v10  ;;  %v2320_v59 = vadd.f32 %v2318_v0, %v2315_v12 }
 0x3d8   :  { %v2297_v58 = vpop.permute.xlu1 %2296  ;;  %2739 = vmatprep.mubr.msk.f32.mxu0 %vm61_vm0, %v2319_v13  ;;  %v2299_v18 = vpop.permute.xlu0 %2298 }
 0x3d9   :  { %v2316_v19 = vsel %vm2313_vm4, %v2311_v15, %v2297_v58  ;;  %v2317_v1 = vsel %vm2313_vm4, %v2312_v16, %v2299_v18  ;;  %2740 = vmatmul.mubr.msk.f32.vlgmr.msra.gmra.mrb[22].mxu0 %vm61_vm0, %v2320_v59 }
 0x3da   :  { %v2321_v21 = vadd.f32 %v2318_v0, %v2316_v19  ;;  %v2322_v22 = vadd.f32 %v2318_v0, %v2317_v1 }
 0x3dc   :  { %2742 = vmatprep.mubr.msk.f32.mxu0 %vm61_vm0, %v2321_v21 }
 0x3dd   :  { %2743 = vmatmul.mubr.msk.f32.gmra.mrb[24].mxu0 %vm61_vm0, %v2322_v22 }
 0x4ac   :  { %v2741_v20 = vpop.f32.mrb[22].mxu0 }
 0x4ad   :  { %v2418_v27 = vadd.f32 %v2741_v20, %v2494_v24  ;;  %v2412_v25 = vpop.f32.mrb[23].mxu0 }
 0x4ae   :  { %v2413_v44 = vadd.f32 %v2494_v24, %v2412_v25 }
 0x4af   :  { %v2432_v51 = vmax.f32 %v2418_v27, 0.0 }
 0x4b0   :  { %v2431_v49 = vmax.f32 %v2413_v44, 0.0  ;;  %v2744_v5 = vpop.f32.mrb[24].mxu0 }
 0x4b1   :  { %v2436_v28 = vadd.f32 %v2432_v51, %v2320_v59  ;;  %v2428_v29 = vadd.f32 %v2744_v5, %v2494_v24  ;;  %v2422_v11 = vpop.f32.mrb[25].mxu0 }
 0x4b2   :  { %v2435_v17 = vadd.f32 %v2431_v49, %v2319_v13  ;;  %v2423_v23 = vadd.f32 %v2494_v24, %v2422_v11 }
 0x4b3   :  { %2440 = vst.msk [vmem:[#allocation5 + $0x8] sm:$0xff] %vm61_vm0, %v2436_v28  ;;  %v2434_v30 = vmax.f32 %v2428_v29, 0.0 }
 0x4b4   :  { %2439 = vst.msk [vmem:[#allocation5] sm:$0xff] %vm61_vm0, %v2435_v17  ;;  %v2433_v31 = vmax.f32 %v2423_v23, 0.0 }
 0x4b5   :  { %v2438_v32 = vadd.f32 %v2434_v30, %v2322_v22 }
 0x4b6   :  { %v2437_v33 = vadd.f32 %v2433_v31, %v2321_v21 }
 0x4b7   :  { %2442 = vst.msk [vmem:[#allocation5 + $0x18] sm:$0xff] %vm61_vm0, %v2438_v32 }
 0x4b8   :  { %2441 = vst.msk [vmem:[#allocation5 + $0x10] sm:$0xff] %vm61_vm0, %v2437_v33 }
 0x4b9   :  { %2946 = shalt.err (!%p2943_p12)
}
 0x4ba   :  { %s2947_s19 = scalar_lea.hbm %s3400_s8, 512 }
 0x4bb   :  { %p2948_p13 = scmp.ne.s32.totalorder %s3400_s8, %s2947_s19  ;;  %p2951_p0 = scmp.lt.u32.totalorder %s2947_s19, %s3400_s8 }
 0x4bd   :  { %p2953_p1 = pnand %p2951_p0, %p2948_p13 }
 0x4bf   :  { %2956 = shalt.err (!%p2953_p1)
}
 0x4c0   :  { %s2972_s24 = smov 128  }
 0x4c1   :  { %2454 = dma.vmem_to_hbm [thread:$0]  %s2449_s16, 512, %s3400_s8, [#allocation4], %s2972_s24, %s2972_s24, %s2968_s27  }
 0x4c2   :  { %2959 = dma.done.wait [#allocation4], 512  }
 0x4c3   :  { %2960 = vsyncadd [#allocation4], 4294966784 }
 0x4c4   :  { %2458 = vsyncpa [#allocation3], 1 }
 0x4c5   :  { %2459 = vsyncpa [#allocation4], 1 }

// kernel: tpu_custom_call.1
= control target key start
LH: loop header
LB: loop body
LE: loop exit
PB: predicated region body
PF: predicated region fallthrough
CT: control target
= control target key end

     0   :  { %13 = vsyncpa [#allocation3], 0  ;;  %s3392_s0 = inlined_call_operand.hbm [shape: f32[8,32], index: 0, kind: input, shape index: {}]   ;;  %s3393_s1 = inlined_call_operand.vmem [shape: f32[64,32], index: 1, kind: input, shape index: {}]   ;;  %s3394_s2 = inlined_call_operand.vmem [shape: f32[32,32], index: 2, kind: input, shape index: {}]   ;;  %s3395_s3 = inlined_call_operand.vmem [shape: f32[1,32], index: 3, kind: input, shape index: {}]   ;;  %s3396_s4 = inlined_call_operand.vmem [shape: f32[32,32], index: 4, kind: input, shape index: {}]   ;;  %s3397_s5 = inlined_call_operand.vmem [shape: f32[1,32], index: 5, kind: input, shape index: {}]   ;;  %s3398_s6 = inlined_call_operand.vmem [shape: f32[32,32], index: 6, kind: input, shape index: {}]   ;;  %s3399_s7 = inlined_call_operand.vmem [shape: f32[1,32], index: 7, kind: input, shape index: {}]   ;;  %s3400_s8 = inlined_call_operand.hbm [shape: f32[32,32], index: 8, kind: output, shape index: {}]  }
   0x1   :  { %14 = vsyncpa [#allocation4], 0  ;;  %s2961_s27 = smov [#allocation2]   ;;  %s2913_s9 = scalar_lea.hbm %s3392_s0, 128 }
   0x2   :  { %s21_s28 = sshll.u32 %s2961_s27, 4  ;;  %p2914_p0 = scmp.ne.s32.totalorder %s3392_s0, %s2913_s9  ;;  %s22_s28 = int_to_ptr.vmem [resolvable:$true] %s21_s28 }
   0x3   :  { %p2917_p1 = scmp.lt.u32.totalorder %s2913_s9, %s3392_s0 }
   0x5   :  { %p2919_p2 = pnand %p2917_p1, %p2914_p0 }
   0x7   :  { %2922 = shalt.err (!%p2919_p2)
}
   0x8   :  { %s2923_s14 = scalar_lea.vmem %s22_s28, 128  ;;  %p2928_p4 = scmp.lt.s32.totalorder %s22_s28, %s22_s28 }
   0x9   :  { %p2924_p3 = scmp.ne.s32.totalorder %s22_s28, %s2923_s14  ;;  %p2929_p5 = scmp.lt.s32.totalorder %s2923_s14, %s2923_s14 }
   0xb   :  { %p2930_p6 = por %p2929_p5, %p2928_p4 }
   0xd   :  { %p2931_p7 = pnand %p2930_p6, %p2924_p3 }
   0xf   :  { %2934 = shalt.err (!%p2931_p7)
}
  0x10   :  { %24 = dma.hbm_to_vmem [thread:$0]  %s3392_s0, 128, %s22_s28, [#allocation3]  }
  0x11   :  { %2957 = dma.done.wait [#allocation3], 128  }
  0x12   :  { %2958 = vsyncadd [#allocation3], 4294967168  ;;  %vm61_vm0 = vcmask 261120   ;;  %v50_v0 = vld [vmem:[%s3394_s2] sm:$0xff]  ;;  %v51_v1 = vld [vmem:[%s3394_s2 + $0x8] sm:$0xff]  ;;  %v2962_v20 = vmov 0.0|0.0  }
  0x13   :  { %v52_v2 = vld [vmem:[%s3394_s2 + $0x10] sm:$0xff]  ;;  %v2745_v3 = vpack.c.bf16 %v51_v1, %v50_v0  ;;  %v53_v4 = vld [vmem:[%s3394_s2 + $0x18] sm:$0xff]  ;;  %v42_v5 = vld [vmem:[%s3393_s1] sm:$0xff]  ;;  %s2965_s26 = smov 104   ;;  %vm2966_vm1 = vmmov 0   ;;  %vm447_vm2 = vcmask 130048  }
  0x14   :  { %v2749_v6 = vpack.c.bf16 %v53_v4, %v52_v2  ;;  %2587 = vmatprep.mubr.msk.f32.mxu0 %vm61_vm0, %v42_v5  ;;  %v299_v7 = vld [vmem:[%s3396_s4] sm:$0xff]  ;;  %2607 = vmatprep.mubr.msk.f32.mxu1 %vm61_vm0, %v42_v5  ;;  %v300_v8 = vld [vmem:[%s3396_s4 + $0x8] sm:$0xff]  ;;  %v301_v9 = vld [vmem:[%s3396_s4 + $0x10] sm:$0xff]  ;;  %s2968_s27 = smov 8   ;;  %s2969_s13 = smov 16   ;;  %vm2304_vm3 = vcmask 64512  }
  0x15   :  { %2746 = vmatprep.subr.bf16.mxu0 %v2745_v3  ;;  %v302_v10 = vld [vmem:[%s3396_s4 + $0x18] sm:$0xff]  ;;  %v2753_v11 = vpack.c.bf16 %v300_v8, %v299_v7  ;;  %v43_v13 = vld [vmem:[%s3393_s1 + $0x8] sm:$0xff]  ;;  %v44_v14 = vld [vmem:[%s3393_s1 + $0x10] sm:$0xff]  ;;  %s2970_s14 = smov 24   ;;  %vm2313_vm4 = vcmask 195584   ;;  %s2971_s15 = smov [#allocation5]  }
  0x16   :  { %2748 = vmatpush3.bf16.msra.mxu0 %v2745_v3  ;;  %v2757_v12 = vpack.c.bf16 %v302_v10, %v301_v9  ;;  %v45_v15 = vld [vmem:[%s3393_s1 + $0x18] sm:$0xff]  ;;  %v46_v16 = vld [vmem:[%s3393_s1 + $0x20] sm:$0xff]  ;;  %v47_v17 = vld [vmem:[%s3393_s1 + $0x28] sm:$0xff]  ;;  %s2448_s16 = sshll.u32 %s2971_s15, 4  ;;  %s2449_s16 = int_to_ptr.vmem [resolvable:$true] %s2448_s16 }
  0x17   :  { %2750 = vmatprep.subr.bf16.mxu0 %v2749_v6  ;;  %2754 = vmatprep.subr.bf16.mxu1 %v2753_v11  ;;  %v48_v18 = vld [vmem:[%s3393_s1 + $0x30] sm:$0xff]  ;;  %v49_v19 = vld [vmem:[%s3393_s1 + $0x38] sm:$0xff]  ;;  %v2460_v21 = vld [vmem:[%s3395_s3] ss:$0 sm:$0xff]  ;;  %s2963_s3 = smov 120   ;;  %p2940_p9 = scmp.lt.s32.totalorder %s2449_s16, %s2449_s16 }
  0x18   :  { %2756 = vmatpush3.bf16.msra.mxu1 %v2753_v11  ;;  %v3104_v25 = vld [vmem:[%s3397_s5] ss:$0 sm:$0xff]  ;;  %s2964_s5 = smov 112  }
  0x19   :  { %2758 = vmatprep.subr.bf16.mxu1 %v2757_v12 }
  0x1a   :  { %2752 = vmatpush3.bf16.msra.mxu0 %v2749_v6 }
  0x1b   :  { %2767 = vmatprep.subr.bf16.mxu0 %v2962_v20 }
  0x1c   :  { %2760 = vmatpush3.bf16.msra.mxu1 %v2757_v12 }
  0x1d   :  { %2588 = vmatmul.mubr.msk.f32.vlgmr.msra.gmra.mrb[0].mxu0 %vm61_vm0, %v43_v13  ;;  %2761 = vmatprep.subr.bf16.mxu1 %v2962_v20 }
  0x1e   :  { %2590 = vmatprep.mubr.msk.f32.mxu0 %vm61_vm0, %v44_v14 }
  0x1f   :  { %2608 = vmatmul.mubr.msk.f32.vlgmr.msra.gmra.mrb[0].mxu1 %vm61_vm0, %v43_v13 }
  0x20   :  { %2610 = vmatprep.mubr.msk.f32.mxu1 %vm61_vm0, %v44_v14 }
  0x21   :  { %2591 = vmatmul.mubr.msk.f32.gmra.mrb[2].mxu0 %vm61_vm0, %v45_v15 }
  0x22   :  { %2593 = vmatprep.mubr.msk.f32.mxu0 %vm61_vm0, %v46_v16 }
  0x23   :  { %2611 = vmatmul.mubr.msk.f32.gmra.mrb[2].mxu1 %vm61_vm0, %v45_v15 }
  0x24   :  { %2613 = vmatprep.mubr.msk.f32.mxu1 %vm61_vm0, %v46_v16 }
  0x25   :  { %2594 = vmatmul.mubr.msk.f32.gmra.mrb[4].mxu0 %vm61_vm0, %v47_v17 }
  0x26   :  { %2596 = vmatprep.mubr.msk.f32.mxu0 %vm61_vm0, %v48_v18 }
  0x27   :  { %2614 = vmatmul.mubr.msk.f32.gmra.mrb[4].mxu1 %vm61_vm0, %v47_v17 }
  0x28   :  { %2616 = vmatprep.mubr.msk.f32.mxu1 %vm61_vm0, %v48_v18 }
  0x29   :  { %2597 = vmatmul.mubr.msk.f32.gmra.mrb[6].mxu0 %vm61_vm0, %v49_v19 }
  0x2b   :  { %2617 = vmatmul.mubr.msk.f32.gmra.mrb[6].mxu1 %vm61_vm0, %v49_v19 }
  0xf0   :  { %v2589_v22 = vpop.f32.mrb[0].mxu0 }
  0xf1   :  { %v3099_v23 = vadd.f32 %v2589_v22, %v2460_v21  ;;  %v152_v24 = vpop.f32.mrb[1].mxu0 }
  0xf2   :  { %v3106_v26 = vadd.f32 %v2460_v21, %v152_v24  ;;  %v2609_v28 = vpop.f32.mrb[0].mxu1 }
  0xf3   :  { %v192_v27 = vsel %vm61_vm0, %v3099_v23, -inf  ;;  %v382_v31 = vadd.f32 %v2609_v28, %v3104_v25  ;;  %v376_v32 = vpop.f32.mrb[1].mxu1 }
  0xf4   :  { %v191_v29 = vsel %vm61_vm0, %v3106_v26, -inf  ;;  %v2592_v30 = vpop.f32.mrb[2].mxu0  ;;  %v377_v36 = vadd.f32 %v3104_v25, %v376_v32 }
  0xf5   :  { %v193_v33 = vmax.f32 %v191_v29, %v192_v27  ;;  %v3113_v34 = vadd.f32 %v2592_v30, %v2460_v21  ;;  %v162_v35 = vpop.f32.mrb[3].mxu0 }
  0xf6   :  { %v3116_v37 = vadd.f32 %v2460_v21, %v162_v35  ;;  %v2829_v40 = vpack.i.bf16 %v382_v31, %v377_v36  ;;  %v2612_v41 = vpop.f32.mrb[2].mxu1  ;;  %v2762_v46 = vpack.c.bf16 %v382_v31, %v377_v36 }
  0xf7   :  { %v194_v38 = vrot.slane %v193_v33, 4  ;;  %v201_v39 = vsel %vm61_vm0, %v3113_v34, -inf  ;;  %v3123_v44 = vadd.f32 %v2612_v41, %v3104_v25  ;;  %v386_v45 = vpop.f32.mrb[3].mxu1 }
  0xf8   :  { %v200_v42 = vsel %vm61_vm0, %v3116_v37, -inf  ;;  %v2595_v43 = vpop.f32.mrb[4].mxu0  ;;  %2830 = vrot.lane.b32.xlu0 %v2829_v40, %s2963_s3  ;;  %v3129_v51 = vadd.f32 %v3104_v25, %v386_v45  ;;  %2763 = vmatpush3.bf16.msra.mxu1 %v2762_v46 }
  0xf9   :  { %v195_v47 = vmax.f32 %v193_v33, %v194_v38  ;;  %v202_v48 = vmax.f32 %v200_v42, %v201_v39  ;;  %v3126_v49 = vadd.f32 %v2595_v43, %v2460_v21  ;;  %v172_v50 = vpop.f32.mrb[5].mxu0  ;;  %2764 = vmatprep.subr.bf16.mxu1 %v2962_v20 }
  0xfa   :  { %v3131_v52 = vadd.f32 %v2460_v21, %v172_v50  ;;  %v2615_v56 = vpop.f32.mrb[4].mxu1  ;;  %v2844_v57 = vpack.i.bf16 %v3123_v44, %v3129_v51  ;;  %v2765_v5 = vpack.c.bf16 %v3123_v44, %v3129_v51 }
  0xfb   :  { %v196_v53 = vrot.slane %v195_v47, 2  ;;  %v203_v54 = vrot.slane %v202_v48, 4  ;;  %v210_v55 = vsel %vm61_vm0, %v3126_v49, -inf  ;;  %v402_v59 = vadd.f32 %v2615_v56, %v3104_v25  ;;  %v396_v60 = vpop.f32.mrb[5].mxu1 }
  0xfc   :  { %v209_v58 = vsel %vm61_vm0, %v3131_v52, -inf  ;;  %v2598_v61 = vpop.f32.mrb[6].mxu0  ;;  %2835 = vrot.lane.b32.xlu0 %v2829_v40, %s2964_s5  ;;  %v397_v1 = vadd.f32 %v3104_v25, %v396_v60  ;;  %2845 = vrot.lane.b32.xlu1 %v2844_v57, %s2963_s3 }
  0xfd   :  { %v197_v62 = vmax.f32 %v195_v47, %v196_v53  ;;  %v204_v63 = vmax.f32 %v202_v48, %v203_v54  ;;  %v211_v0 = vmax.f32 %v209_v58, %v210_v55  ;;  %v182_v2 = vpop.f32.mrb[7].mxu0  ;;  %v3144_v3 = vadd.f32 %v2598_v61, %v2460_v21 }
  0xfe   :  { %v3146_v4 = vadd.f32 %v2460_v21, %v182_v2  ;;  %v2618_v9 = vpop.f32.mrb[6].mxu1  ;;  %v2859_v10 = vpack.i.bf16 %v402_v59, %v397_v1  ;;  %v2768_v13 = vpack.c.bf16 %v402_v59, %v397_v1 }
  0xff   :  { %v198_v6 = vrot.slane %v197_v62, 1  ;;  %v205_v7 = vrot.slane %v204_v63, 2  ;;  %v212_v8 = vrot.slane %v211_v0, 4  ;;  %v3151_v11 = vadd.f32 %v2618_v9, %v3104_v25  ;;  %v406_v12 = vpop.f32.mrb[7].mxu1 }
 0x100   :  { %2840 = vrot.lane.b32.xlu0 %v2829_v40, %s2965_s26  ;;  %v3155_v17 = vadd.f32 %v3104_v25, %v406_v12  ;;  %2850 = vrot.lane.b32.xlu1 %v2844_v57, %s2964_s5  ;;  %v219_v18 = vsel %vm61_vm0, %v3144_v3, -inf  ;;  %v218_v19 = vsel %vm61_vm0, %v3146_v4, -inf }
 0x101   :  { %v199_v14 = vmax.f32 %v197_v62, %v198_v6  ;;  %v206_v15 = vmax.f32 %v204_v63, %v205_v7  ;;  %v213_v16 = vmax.f32 %v211_v0, %v212_v8  ;;  %2769 = vmatpush3.bf16.msra.mxu0 %v2768_v13  ;;  %v220_v28 = vmax.f32 %v218_v19, %v219_v18 }
 0x102   :  { %2773 = vmatprep.subr.bf16.mxu0 %v2962_v20  ;;  %v2874_v25 = vpack.i.bf16 %v3151_v11, %v3155_v17 }
 0x103   :  { %v227_v21 = vsub.f32 %v3106_v26, %v199_v14  ;;  %v228_v22 = vsub.f32 %v3099_v23, %v199_v14  ;;  %v207_v24 = vrot.slane %v206_v15, 1  ;;  %v214_v27 = vrot.slane %v213_v16, 2 }
 0x104   :  { %2855 = vrot.lane.b32.xlu0 %v2844_v57, %s2965_s26  ;;  %2875 = vrot.lane.b32.xlu1 %v2874_v25, %s2963_s3  ;;  %v221_v33 = vrot.slane %v220_v28, 4  ;;  %v2771_v23 = vpack.c.bf16 %v3151_v11, %v3155_v17 }
 0x105   :  { %v235_v29 = vmul.f32 1.442695, %v227_v21  ;;  %v237_v30 = vmul.f32 1.442695, %v228_v22  ;;  %v208_v31 = vmax.f32 %v206_v15, %v207_v24  ;;  %v215_v32 = vmax.f32 %v213_v16, %v214_v27 }
 0x106   :  { %v222_v38 = vmax.f32 %v220_v28, %v221_v33 }
 0x107   :  { %2889 = vpow2.f32 %v235_v29  ;;  %v229_v26 = vsub.f32 %v3116_v37, %v208_v31  ;;  %v230_v35 = vsub.f32 %v3113_v34, %v208_v31  ;;  %v216_v36 = vrot.slane %v215_v32, 1 }
 0x108   :  { %2891 = vpow2.f32 %v237_v30  ;;  %2860 = vrot.lane.b32.xlu0 %v2859_v10, %s2963_s3  ;;  %2880 = vrot.lane.b32.xlu1 %v2874_v25, %s2964_s5  ;;  %v223_v42 = vrot.slane %v222_v38, 2 }
 0x109   :  { %v239_v39 = vmul.f32 1.442695, %v229_v26  ;;  %v241_v40 = vmul.f32 1.442695, %v230_v35  ;;  %v217_v41 = vmax.f32 %v215_v32, %v216_v36 }
 0x10a   :  { %v224_v37 = vmax.f32 %v222_v38, %v223_v42 }
 0x10b   :  { %2893 = vpow2.f32 %v239_v39  ;;  %v231_v43 = vsub.f32 %v3131_v52, %v217_v41  ;;  %v232_v45 = vsub.f32 %v3126_v49, %v217_v41 }
 0x10c   :  { %2895 = vpow2.f32 %v241_v40  ;;  %2865 = vrot.lane.b32.xlu0 %v2859_v10, %s2964_s5  ;;  %2885 = vrot.lane.b32.xlu1 %v2874_v25, %s2965_s26  ;;  %v225_v47 = vrot.slane %v224_v37, 1 }
 0x10d   :  { %v243_v46 = vmul.f32 1.442695, %v231_v43  ;;  %v245_v34 = vmul.f32 1.442695, %v232_v45 }
 0x10e   :  { %v226_v48 = vmax.f32 %v224_v37, %v225_v47 }
 0x10f   :  { %2897 = vpow2.f32 %v243_v46 }
 0x110   :  { %2899 = vpow2.f32 %v245_v34  ;;  %2870 = vrot.lane.b32.xlu0 %v2859_v10, %s2965_s26  ;;  %v233_v49 = vsub.f32 %v3146_v4, %v226_v48  ;;  %v234_v54 = vsub.f32 %v3144_v3, %v226_v48 }
 0x111   :  { %v2890_v50 = vpop.eup %2889 }
 0x112   :  { %v2892_v53 = vpop.eup %2891  ;;  %v251_v52 = vsel %vm61_vm0, %v2890_v50, 0.0  ;;  %v247_v57 = vmul.f32 1.442695, %v233_v49  ;;  %v249_v58 = vmul.f32 1.442695, %v234_v54  ;;  %v2967_v49 = vmov 0.0  }
 0x113   :  { %v252_v55 = vsel %vm61_vm0, %v2892_v53, 0.0  ;;  %2623 = vmatprep.mubr.msk.f32.mxu1 %vm2966_vm1, %v2967_v49  ;;  %2637 = vmatprep.mubr.msk.f32.mxu0 %vm2966_vm1, %v2967_v49 }
 0x114   :  { %v253_v56 = vadd.f32 %v252_v55, %v251_v52  ;;  %2901 = vpow2.f32 %v247_v57 }
 0x115   :  { %v2894_v59 = vpop.eup %2893  ;;  %2903 = vpow2.f32 %v249_v58 }
 0x116   :  { %v2896_v60 = vpop.eup %2895  ;;  %v254_v61 = vrot.slane %v253_v56, 4  ;;  %v260_v62 = vsel %vm61_vm0, %v2894_v59, 0.0 }
 0x117   :  { %v261_v63 = vsel %vm61_vm0, %v2896_v60, 0.0 }
 0x118   :  { %v255_v0 = vadd.f32 %v254_v61, %v253_v56  ;;  %v262_v1 = vadd.f32 %v261_v63, %v260_v62 }
 0x119   :  { %v2898_v2 = vpop.eup %2897 }
 0x11a   :  { %v2900_v4 = vpop.eup %2899  ;;  %v256_v6 = vrot.slane %v255_v0, 2  ;;  %v263_v3 = vrot.slane %v262_v1, 4  ;;  %v269_v7 = vsel %vm61_vm0, %v2898_v2, 0.0 }
 0x11b   :  { %v270_v8 = vsel %vm61_vm0, %v2900_v4, 0.0 }
 0x11c   :  { %v257_v9 = vadd.f32 %v256_v6, %v255_v0  ;;  %v264_v10 = vadd.f32 %v263_v3, %v262_v1  ;;  %v271_v12 = vadd.f32 %v270_v8, %v269_v7 }
 0x11e   :  { %v265_v13 = vrot.slane %v264_v10, 2  ;;  %v272_v14 = vrot.slane %v271_v12, 4  ;;  %v258_v15 = vrot.slane %v257_v9, 1  ;;  %v2902_v16 = vpop.eup %2901 }
 0x11f   :  { %v2904_v22 = vpop.eup %2903  ;;  %v278_v24 = vsel %vm61_vm0, %v2902_v16, 0.0 }
 0x120   :  { %v266_v18 = vadd.f32 %v265_v13, %v264_v10  ;;  %v273_v19 = vadd.f32 %v272_v14, %v271_v12  ;;  %v259_v21 = vadd.f32 %v258_v15, %v257_v9  ;;  %v279_v25 = vsel %vm61_vm0, %v2904_v22, 0.0 }
 0x121   :  { %v280_v29 = vadd.f32 %v279_v25, %v278_v24 }
 0x122   :  { %v274_v27 = vrot.slane %v273_v19, 2  ;;  %2905 = vrcp.f32 %v259_v21  ;;  %v267_v28 = vrot.slane %v266_v18, 1 }
 0x123   :  { %v281_v32 = vrot.slane %v280_v29, 4 }
 0x124   :  { %v275_v30 = vadd.f32 %v274_v27, %v273_v19  ;;  %v268_v31 = vadd.f32 %v267_v28, %v266_v18 }
 0x125   :  { %v282_v26 = vadd.f32 %v281_v32, %v280_v29 }
 0x126   :  { %2907 = vrcp.f32 %v268_v31  ;;  %v276_v33 = vrot.slane %v275_v30, 1 }
 0x127   :  { %v283_v36 = vrot.slane %v282_v26, 2 }
 0x128   :  { %v277_v35 = vadd.f32 %v276_v33, %v275_v30 }
 0x129   :  { %v284_v38 = vadd.f32 %v283_v36, %v282_v26 }
 0x12a   :  { %2909 = vrcp.f32 %v277_v35 }
 0x12b   :  { %v285_v42 = vrot.slane %v284_v38, 1 }
 0x12c   :  { %v2906_v39 = vpop.eup %2905 }
 0x12d   :  { %v292_v40 = vmul.f32 %v2906_v39, %v2892_v53  ;;  %v291_v41 = vmul.f32 %v2906_v39, %v2890_v50  ;;  %v286_v43 = vadd.f32 %v285_v42, %v284_v38 }
 0x12f   :  { %840 = vrot.lane.b32.xlu1 %v292_v40, %s2963_s3  ;;  %838 = vrot.lane.b32.xlu0 %v291_v41, %s2963_s3  ;;  %2911 = vrcp.f32 %v286_v43 }
 0x130   :  { %v2908_v45 = vpop.eup %2907 }
 0x131   :  { %v294_v37 = vmul.f32 %v2908_v45, %v2896_v60  ;;  %v293_v46 = vmul.f32 %v2908_v45, %v2894_v59 }
 0x133   :  { %961 = vrot.lane.b32.xlu1 %v294_v37, %s2963_s3  ;;  %1320 = vrot.lane.b32.xlu0 %v291_v41, %s2964_s5 }
 0x134   :  { %v2910_v34 = vpop.eup %2909 }
 0x135   :  { %v295_v47 = vmul.f32 %v2910_v34, %v2898_v2  ;;  %v296_v48 = vmul.f32 %v2910_v34, %v2900_v4 }
 0x137   :  { %1437 = vrot.lane.b32.xlu1 %v293_v46, %s2964_s5  ;;  %1322 = vrot.lane.b32.xlu0 %v292_v40, %s2964_s5 }
 0x139   :  { %v2912_v50 = vpop.eup %2911 }
 0x13a   :  { %v297_v53 = vmul.f32 %v2912_v50, %v2902_v16  ;;  %v298_v52 = vmul.f32 %v2912_v50, %v2904_v22 }
 0x13b   :  { %1439 = vrot.lane.b32.xlu1 %v294_v37, %s2964_s5  ;;  %1788 = vrot.lane.b32.xlu0 %v291_v41, %s2965_s26 }
 0x13f   :  { %1905 = vrot.lane.b32.xlu1 %v293_v46, %s2965_s26  ;;  %1790 = vrot.lane.b32.xlu0 %v292_v40, %s2965_s26 }
 0x143   :  { %1907 = vrot.lane.b32.xlu1 %v294_v37, %s2965_s26  ;;  %959 = vrot.lane.b32.xlu0 %v293_v46, %s2963_s3 }
 0x147   :  { %1080 = vrot.lane.b32.xlu0 %v295_v47, %s2963_s3 }
 0x14b   :  { %1082 = vrot.lane.b32.xlu0 %v296_v48, %s2963_s3 }
 0x14f   :  { %1554 = vrot.lane.b32.xlu0 %v295_v47, %s2964_s5 }
 0x153   :  { %1556 = vrot.lane.b32.xlu0 %v296_v48, %s2964_s5 }
 0x157   :  { %2022 = vrot.lane.b32.xlu0 %v295_v47, %s2965_s26 }
 0x15b   :  { %2024 = vrot.lane.b32.xlu0 %v296_v48, %s2965_s26 }
 0x16a   :  { %v3212_v54 = vpop.permute.xlu0 %2830 }
 0x16b   :  { %v2833_v44 = vunpack.i.h.bf16 %v3212_v54  ;;  %v2832_v51 = vunpack.i.l.bf16 %v3212_v54 }
 0x16c   :  { %415 = vxpose.xlu1.b32.start [1/2] (short) (narrow) %v291_v41, 8 }
 0x16d   :  { %v2774_v28 = vpack.c.bf16 %v2833_v44, %v2832_v51 }
 0x16e   :  { %v3214_v55 = vpop.permute.xlu0 %2835  ;;  %v3218_v57 = vpop.permute.xlu1 %2845 }
 0x16f   :  { %v2848_v17 = vunpack.i.h.bf16 %v3218_v57  ;;  %v2837_v34 = vunpack.i.l.bf16 %v3214_v55 }
 0x170   :  { %416 = vxpose.xlu1.b32.end [2/2] (short) (narrow) %v292_v40, 8 }
 0x172   :  { %v3216_v56 = vpop.permute.xlu0 %2840  ;;  %v3223_v59 = vpop.permute.xlu1 %2850 }
 0x176   :  { %v3220_v58 = vpop.permute.xlu0 %2855  ;;  %v3228_v61 = vpop.permute.xlu1 %2875 }
 0x177   :  { %v2878_v41 = vunpack.i.h.bf16 %v3228_v61  ;;  %v2877_v42 = vunpack.i.l.bf16 %v3228_v61 }
 0x179   :  { %521 = vxpose.xlu0.b32.start [1/2] (short) (narrow) %v293_v46, 8  ;;  %v2783_v43 = vpack.c.bf16 %v2878_v41, %v2877_v42  ;;  %v2838_v46 = vunpack.i.h.bf16 %v3214_v55  ;;  %v2843_v55 = vunpack.i.h.bf16 %v3216_v56 }
 0x17a   :  { %v3225_v60 = vpop.permute.xlu0 %2860  ;;  %v3234_v63 = vpop.permute.xlu1 %2880 }
 0x17b   :  { %v2863_v36 = vunpack.i.h.bf16 %v3225_v60  ;;  %v2862_v38 = vunpack.i.l.bf16 %v3225_v60  ;;  %v2842_v60 = vunpack.i.l.bf16 %v3216_v56  ;;  %v2853_v56 = vunpack.i.h.bf16 %v3223_v59 }
 0x17d   :  { %522 = vxpose.xlu0.b32.end [2/2] (short) (narrow) %v294_v37, 8  ;;  %v2780_v39 = vpack.c.bf16 %v2863_v36, %v2862_v38  ;;  %v2798_v61 = vpack.c.bf16 %v2843_v55, %v2842_v60  ;;  %v2325_v38 = vld [vmem:[%s3398_s6 + $0x10] sm:$0xff] }
 0x17e   :  { %v3231_v62 = vpop.permute.xlu0 %2865  ;;  %v3239_v1 = vpop.permute.xlu1 %2885 }
 0x17f   :  { %v2868_v50 = vunpack.i.h.bf16 %v3231_v62 }
 0x181   :  { %626 = vxpose.xlu0.b32.start [1/2] (short) (narrow) %v295_v47, 8 }
 0x182   :  { %v3236_v0 = vpop.permute.xlu0 %2870 }
 0x185   :  { %627 = vxpose.xlu0.b32.end [2/2] (short) (narrow) %v296_v48, 8  ;;  %v2786_v48 = vpack.c.bf16 %v2838_v46, %v2837_v34 }
 0x189   :  { %731 = vxpose.xlu0.b32.start [1/2] (short) (narrow) %v297_v53, 8 }
 0x18d   :  { %732 = vxpose.xlu0.b32.end [2/2] (short) (narrow) %v298_v52, 8 }
 0x18e   :  { %1201 = vrot.lane.b32.xlu1 %v297_v53, %s2963_s3 }
 0x192   :  { %1203 = vrot.lane.b32.xlu1 %v298_v52, %s2963_s3 }
 0x196   :  { %1671 = vrot.lane.b32.xlu1 %v297_v53, %s2964_s5 }
 0x19a   :  { %1673 = vrot.lane.b32.xlu1 %v298_v52, %s2964_s5 }
 0x19e   :  { %2139 = vrot.lane.b32.xlu1 %v297_v53, %s2965_s26  ;;  %v2867_v53 = vunpack.i.l.bf16 %v3231_v62  ;;  %v2873_v62 = vunpack.i.h.bf16 %v3236_v0 }
 0x1a0   :  { %v2792_v54 = vpack.c.bf16 %v2868_v50, %v2867_v53 }
 0x1a1   :  { %v839_v2 = vpop.permute.xlu0 %838  ;;  %v841_v4 = vpop.permute.xlu1 %840 }
 0x1a2   :  { %2141 = vrot.lane.b32.xlu1 %v298_v52, %s2965_s26  ;;  %844 = vxpose.xlu0.b32.start [1/2] (short) (narrow) %v839_v2, 8  ;;  %v2872_v2 = vunpack.i.l.bf16 %v3236_v0  ;;  %v2852_v0 = vunpack.i.l.bf16 %v3223_v59 }
 0x1a5   :  { %v1321_v6 = vpop.permute.xlu0 %1320  ;;  %v962_v10 = vpop.permute.xlu1 %961 }
 0x1a6   :  { %845 = vxpose.xlu0.b32.end [2/2] (short) (narrow) %v841_v4, 8 }
 0x1a9   :  { %v1323_v3 = vpop.permute.xlu0 %1322  ;;  %v1438_v12 = vpop.permute.xlu1 %1437 }
 0x1ad   :  { %v1789_v7 = vpop.permute.xlu0 %1788  ;;  %v1440_v14 = vpop.permute.xlu1 %1439 }
 0x1b1   :  { %v1791_v8 = vpop.permute.xlu0 %1790  ;;  %v1906_v16 = vpop.permute.xlu1 %1905 }
 0x1b5   :  { %v960_v9 = vpop.permute.xlu0 %959  ;;  %v1908_v19 = vpop.permute.xlu1 %1907 }
 0x1b6   :  { %965 = vxpose.xlu0.b32.start [1/2] (short) (narrow) %v960_v9, 8 }
 0x1b9   :  { %v1081_v13 = vpop.permute.xlu0 %1080 }
 0x1ba   :  { %966 = vxpose.xlu0.b32.end [2/2] (short) (narrow) %v962_v10, 8  ;;  %v2858_v10 = vunpack.i.h.bf16 %v3220_v58 }
 0x1bd   :  { %v1083_v15 = vpop.permute.xlu0 %1082 }
 0x1be   :  { %1326 = vxpose.xlu0.b32.start [1/2] (short) (narrow) %v1321_v6, 8  ;;  %v2804_v6 = vpack.c.bf16 %v2873_v62, %v2872_v2 }
 0x1c1   :  { %v1555_v18 = vpop.permute.xlu0 %1554 }
 0x1c2   :  { %1327 = vxpose.xlu0.b32.end [2/2] (short) (narrow) %v1323_v3, 8  ;;  %v2789_v3 = vpack.c.bf16 %v2853_v56, %v2852_v0  ;;  %v2318_v0 = vld [vmem:[#allocation2] sm:$0xff] }
 0x1c5   :  { %v1557_v21 = vpop.permute.xlu0 %1556 }
 0x1c6   :  { %1443 = vxpose.xlu0.b32.start [1/2] (short) (narrow) %v1438_v12, 8  ;;  %v2857_v12 = vunpack.i.l.bf16 %v3220_v58 }
 0x1c8   :  { %v2801_v59 = vpack.c.bf16 %v2858_v10, %v2857_v12 }
 0x1c9   :  { %v2023_v24 = vpop.permute.xlu0 %2022 }
 0x1ca   :  { %1444 = vxpose.xlu0.b32.end [2/2] (short) (narrow) %v1440_v14, 8  ;;  %v2887_v14 = vunpack.i.l.bf16 %v3239_v1 }
 0x1cb   :  { %1086 = vxpose.xlu1.b32.start [1/2] (short) (narrow) %v1081_v13, 8 }
 0x1cd   :  { %v2025_v27 = vpop.permute.xlu0 %2024 }
 0x1ce   :  { %1794 = vxpose.xlu0.b32.start [1/2] (short) (narrow) %v1789_v7, 8  ;;  %v2883_v7 = vunpack.i.h.bf16 %v3234_v63 }
 0x1cf   :  { %1087 = vxpose.xlu1.b32.end [2/2] (short) (narrow) %v1083_v15, 8 }
 0x1d2   :  { %1795 = vxpose.xlu0.b32.end [2/2] (short) (narrow) %v1791_v8, 8  ;;  %v2882_v8 = vunpack.i.l.bf16 %v3234_v63  ;;  %v2888_v63 = vunpack.i.h.bf16 %v3239_v1 }
 0x1d3   :  { %1911 = vxpose.xlu1.b32.start [1/2] (short) (narrow) %v1906_v16, 8 }
 0x1d4   :  { %v2795_v13 = vpack.c.bf16 %v2883_v7, %v2882_v8  ;;  %v2807_v58 = vpack.c.bf16 %v2888_v63, %v2887_v14 }
 0x1d6   :  { %1560 = vxpose.xlu0.b32.start [1/2] (short) (narrow) %v1555_v18, 8 }
 0x1d7   :  { %1912 = vxpose.xlu1.b32.end [2/2] (short) (narrow) %v1908_v19, 8 }
 0x1da   :  { %1561 = vxpose.xlu0.b32.end [2/2] (short) (narrow) %v1557_v21, 8 }
 0x1ec   :  { %v431_v22 = vpop.trf.xlu1 }
 0x1ed   :  { %2624 = vmatmul.mubr.msk.f32.vlgmr.msra.gmra.mrb[8].mxu1 %vm447_vm2, %v431_v22 }
 0x1ee   :  { %2766 = vmatpush3.bf16.msra.mxu1 %v2765_v5  ;;  %2630 = vmatprep.mubr.msk.f32.mxu1 %vm2966_vm1, %v2967_v49 }
 0x1ef   :  { %2770 = vmatprep.subr.bf16.mxu1 %v2962_v20 }
 0x1f9   :  { %v537_v25 = vpop.trf.xlu0 }
 0x1fa   :  { %2631 = vmatmul.mubr.msk.f32.vlgmr.msra.gmra.mrb[10].mxu1 %vm447_vm2, %v537_v25 }
 0x1fb   :  { %2772 = vmatpush3.bf16.msra.mxu1 %v2771_v23  ;;  %2644 = vmatprep.mubr.msk.f32.mxu1 %vm2966_vm1, %v2967_v49  ;;  %v2847_v23 = vunpack.i.l.bf16 %v3218_v57 }
 0x1fc   :  { %2776 = vmatprep.subr.bf16.mxu1 %v2962_v20 }
 0x1fd   :  { %v2777_v31 = vpack.c.bf16 %v2848_v17, %v2847_v23 }
 0x200   :  { %v1202_v5 = vpop.permute.xlu1 %1201 }
 0x201   :  { %1207 = vxpose.xlu0.b32.start [1/2] (short) (narrow) %v1202_v5, 8  ;;  %v642_v29 = vpop.trf.xlu0 }
 0x202   :  { %2638 = vmatmul.mubr.msk.f32.vlgmr.msra.gmra.mrb[8].mxu0 %vm447_vm2, %v642_v29 }
 0x203   :  { %2775 = vmatpush3.bf16.msra.mxu0 %v2774_v28  ;;  %2651 = vmatprep.mubr.msk.f32.mxu0 %vm2966_vm1, %v2967_v49 }
 0x204   :  { %v1204_v11 = vpop.permute.xlu1 %1203  ;;  %2779 = vmatprep.subr.bf16.mxu0 %v2962_v20 }
 0x205   :  { %1208 = vxpose.xlu0.b32.end [2/2] (short) (narrow) %v1204_v11, 8 }
 0x208   :  { %v1672_v30 = vpop.permute.xlu1 %1671 }
 0x209   :  { %1677 = vxpose.xlu0.b32.start [1/2] (short) (narrow) %v1672_v30, 8  ;;  %v747_v32 = vpop.trf.xlu0 }
 0x20a   :  { %2645 = vmatmul.mubr.msk.f32.vlgmr.msra.gmra.mrb[12].mxu1 %vm447_vm2, %v747_v32 }
 0x20b   :  { %2778 = vmatpush3.bf16.msra.mxu1 %v2777_v31  ;;  %2658 = vmatprep.mubr.msk.f32.mxu1 %vm2966_vm1, %v2967_v49 }
 0x20c   :  { %v1674_v33 = vpop.permute.xlu1 %1673  ;;  %2782 = vmatprep.subr.bf16.mxu1 %v2962_v20 }
 0x20d   :  { %1678 = vxpose.xlu0.b32.end [2/2] (short) (narrow) %v1674_v33, 8 }
 0x210   :  { %v2140_v26 = vpop.permute.xlu1 %2139 }
 0x211   :  { %2145 = vxpose.xlu1.b32.start [1/2] (short) (narrow) %v2140_v26, 8  ;;  %2028 = vxpose.xlu0.b32.start [1/2] (short) (narrow) %v2023_v24, 8  ;;  %v2323_v26 = vld [vmem:[%s3398_s6] sm:$0xff] }
 0x214   :  { %v2142_v35 = vpop.permute.xlu1 %2141 }
 0x215   :  { %2146 = vxpose.xlu1.b32.end [2/2] (short) (narrow) %v2142_v35, 8  ;;  %2029 = vxpose.xlu0.b32.end [2/2] (short) (narrow) %v2025_v27, 8  ;;  %v2324_v35 = vld [vmem:[%s3398_s6 + $0x8] sm:$0xff] }
 0x216   :  { %v2809_v36 = vpack.c.bf16 %v2324_v35, %v2323_v26 }
 0x222   :  { %v860_v40 = vpop.trf.xlu0 }
 0x223   :  { %2652 = vmatmul.mubr.msk.f32.vlgmr.msra.gmra.mrb[10].mxu0 %vm447_vm2, %v860_v40 }
 0x224   :  { %2781 = vmatpush3.bf16.msra.mxu0 %v2780_v39  ;;  %2665 = vmatprep.mubr.msk.f32.mxu0 %vm2966_vm1, %v2967_v49  ;;  %v2326_v39 = vld [vmem:[%s3398_s6 + $0x18] sm:$0xff] }
 0x225   :  { %2785 = vmatprep.subr.bf16.mxu0 %v2962_v20  ;;  %v2813_v40 = vpack.c.bf16 %v2326_v39, %v2325_v38 }
 0x236   :  { %v981_v45 = vpop.trf.xlu0 }
 0x237   :  { %2659 = vmatmul.mubr.msk.f32.vlgmr.msra.gmra.mrb[14].mxu1 %vm447_vm2, %v981_v45 }
 0x238   :  { %2784 = vmatpush3.bf16.msra.mxu1 %v2783_v43  ;;  %2672 = vmatprep.mubr.msk.f32.mxu1 %vm2966_vm1, %v2967_v49 }
 0x239   :  { %2788 = vmatprep.subr.bf16.mxu1 %v2962_v20 }
 0x23e   :  { %v1342_v37 = vpop.trf.xlu0 }
 0x246   :  { %v1459_v47 = vpop.trf.xlu0 }
 0x24b   :  { %v1102_v52 = vpop.trf.xlu1 }
 0x24c   :  { %2666 = vmatmul.mubr.msk.f32.vlgmr.msra.gmra.mrb[12].mxu0 %vm447_vm2, %v1102_v52 }
 0x24d   :  { %2787 = vmatpush3.bf16.msra.mxu0 %v2786_v48  ;;  %2679 = vmatprep.mubr.msk.f32.mxu0 %vm2966_vm1, %v2967_v49 }
 0x24e   :  { %2791 = vmatprep.subr.bf16.mxu0 %v2962_v20  ;;  %v1810_v57 = vpop.trf.xlu0 }
 0x250   :  { %2680 = vmatmul.mubr.msk.f32.vlgmr.msra.gmra.mrb[14].mxu0 %vm447_vm2, %v1342_v37 }
 0x251   :  { %2793 = vmatpush3.bf16.msra.mxu0 %v2792_v54  ;;  %2693 = vmatprep.mubr.msk.f32.mxu0 %vm2966_vm1, %v2967_v49 }
 0x252   :  { %2797 = vmatprep.subr.bf16.mxu0 %v2962_v20 }
 0x253   :  { %v1927_v16 = vpop.trf.xlu1 }
 0x256   :  { %v1576_v4 = vpop.trf.xlu0 }
 0x257   :  { %2694 = vmatmul.mubr.msk.f32.vlgmr.msra.gmra.mrb[16].mxu0 %vm447_vm2, %v1576_v4 }
 0x258   :  { %2799 = vmatpush3.bf16.msra.mxu0 %v2798_v61  ;;  %2707 = vmatprep.mubr.msk.f32.mxu0 %vm2966_vm1, %v2967_v49 }
 0x259   :  { %2803 = vmatprep.subr.bf16.mxu0 %v2962_v20 }
 0x25b   :  { %2708 = vmatmul.mubr.msk.f32.vlgmr.msra.gmra.mrb[18].mxu0 %vm447_vm2, %v1810_v57 }
 0x25c   :  { %2805 = vmatpush3.bf16.msra.mxu0 %v2804_v6  ;;  %2721 = vmatprep.mubr.msk.f32.mxu0 %vm2966_vm1, %v2967_v49 }
 0x25d   :  { %2810 = vmatprep.subr.bf16.mxu0 %v2809_v36 }
 0x281   :  { %v1223_v9 = vpop.trf.xlu0 }
 0x282   :  { %2673 = vmatmul.mubr.msk.f32.vlgmr.msra.gmra.mrb[16].mxu1 %vm447_vm2, %v1223_v9 }
 0x283   :  { %2790 = vmatpush3.bf16.msra.mxu1 %v2789_v3  ;;  %2686 = vmatprep.mubr.msk.f32.mxu1 %vm2966_vm1, %v2967_v49 }
 0x284   :  { %2794 = vmatprep.subr.bf16.mxu1 %v2962_v20 }
 0x286   :  { %2687 = vmatmul.mubr.msk.f32.vlgmr.msra.gmra.mrb[18].mxu1 %vm447_vm2, %v1459_v47 }
 0x287   :  { %2796 = vmatpush3.bf16.msra.mxu1 %v2795_v13  ;;  %2700 = vmatprep.mubr.msk.f32.mxu1 %vm2966_vm1, %v2967_v49 }
 0x288   :  { %2800 = vmatprep.subr.bf16.mxu1 %v2962_v20 }
 0x289   :  { %v1693_v15 = vpop.trf.xlu0 }
 0x28a   :  { %2701 = vmatmul.mubr.msk.f32.vlgmr.msra.gmra.mrb[20].mxu1 %vm447_vm2, %v1693_v15 }
 0x28b   :  { %2802 = vmatpush3.bf16.msra.mxu1 %v2801_v59  ;;  %2714 = vmatprep.mubr.msk.f32.mxu1 %vm2966_vm1, %v2967_v49 }
 0x28c   :  { %2806 = vmatprep.subr.bf16.mxu1 %v2962_v20 }
 0x28e   :  { %2715 = vmatmul.mubr.msk.f32.vlgmr.msra.gmra.mrb[22].mxu1 %vm447_vm2, %v1927_v16 }
 0x28f   :  { %2808 = vmatpush3.bf16.msra.mxu1 %v2807_v58  ;;  %2728 = vmatprep.mubr.msk.f32.mxu1 %vm2966_vm1, %v2967_v49 }
 0x291   :  { %v2161_v18 = vpop.trf.xlu1  ;;  %v2044_v19 = vpop.trf.xlu0 }
 0x292   :  { %2722 = vmatmul.mubr.msk.f32.vlgmr.msra.gmra.mrb[20].mxu0 %vm447_vm2, %v2044_v19  ;;  %2729 = vmatmul.mubr.msk.f32.vlgmr.msra.gmra.mrb[24].mxu1 %vm447_vm2, %v2161_v18 }
 0x293   :  { %2812 = vmatpush3.bf16.msra.mxu0 %v2809_v36 }
 0x294   :  { %2814 = vmatprep.subr.bf16.mxu0 %v2813_v40 }
 0x297   :  { %2816 = vmatpush3.bf16.msra.mxu0 %v2813_v40 }
 0x2c0   :  { %v3328_v1 = vpop.f32.mrb[8].mxu1 }
 0x2c1   :  { %v2625_v21 = vpop.f32.mrb[9].mxu1 }
 0x2cd   :  { %v3330_v22 = vpop.f32.mrb[10].mxu1 }
 0x2ce   :  { %v2632_v24 = vpop.f32.mrb[11].mxu1 }
 0x2cf   :  { %v2494_v24 = vld [vmem:[%s3399_s7] ss:$0 sm:$0xff]  ;;  %s2935_s7 = scalar_lea.vmem %s2449_s16, 512 }
 0x2d0   :  { %p2936_p8 = scmp.ne.s32.totalorder %s2449_s16, %s2935_s7  ;;  %p2941_p10 = scmp.lt.s32.totalorder %s2935_s7, %s2935_s7 }
 0x2d2   :  { %p2942_p11 = por %p2941_p10, %p2940_p9 }
 0x2d4   :  { %p2943_p12 = pnand %p2942_p11, %p2936_p8 }
 0x2d5   :  { %v3332_v20 = vpop.f32.mrb[8].mxu0 }
 0x2d6   :  { %v2639_v27 = vpop.f32.mrb[9].mxu0 }
 0x2dd   :  { %v3334_v25 = vpop.f32.mrb[12].mxu1 }
 0x2de   :  { %v2646_v44 = vpop.f32.mrb[13].mxu1 }
 0x2f6   :  { %v953_v51 = vpop.f32.mrb[10].mxu0 }
 0x2f7   :  { %2260 = vrot.lane.b32.xlu0 %v953_v51, %s2968_s27  ;;  %v2653_v49 = vpop.f32.mrb[11].mxu0 }
 0x30a   :  { %v1074_v5 = vpop.f32.mrb[14].mxu1 }
 0x30b   :  { %2262 = vrot.lane.b32.xlu1 %v1074_v5, %s2968_s27  ;;  %v2660_v28 = vpop.f32.mrb[15].mxu1 }
 0x31f   :  { %v1195_v29 = vpop.f32.mrb[12].mxu0 }
 0x320   :  { %2264 = vrot.lane.b32.xlu1 %v1195_v29, %s2968_s27  ;;  %v2667_v11 = vpop.f32.mrb[13].mxu0 }
 0x323   :  { %v1433_v17 = vpop.f32.mrb[14].mxu0 }
 0x324   :  { %v2681_v23 = vpop.f32.mrb[15].mxu0 }
 0x32a   :  { %v1667_v30 = vpop.f32.mrb[16].mxu0 }
 0x32b   :  { %v2695_v31 = vpop.f32.mrb[17].mxu0 }
 0x32e   :  { %v1901_v32 = vpop.f32.mrb[18].mxu0 }
 0x32f   :  { %v2709_v33 = vpop.f32.mrb[19].mxu0 }
 0x355   :  { %v1316_v41 = vpop.f32.mrb[16].mxu1 }
 0x356   :  { %2266 = vrot.lane.b32.xlu1 %v1316_v41, %s2968_s27  ;;  %v2674_v42 = vpop.f32.mrb[17].mxu1 }
 0x359   :  { %v1550_v43 = vpop.f32.mrb[18].mxu1 }
 0x35a   :  { %2276 = vrot.lane.b32.xlu1 %v1433_v17, %s2969_s13  ;;  %2278 = vrot.lane.b32.xlu0 %v1550_v43, %s2969_s13  ;;  %v2688_v45 = vpop.f32.mrb[19].mxu1 }
 0x35d   :  { %v1784_v37 = vpop.f32.mrb[20].mxu1 }
 0x35e   :  { %2280 = vrot.lane.b32.xlu1 %v1667_v30, %s2969_s13  ;;  %2282 = vrot.lane.b32.xlu0 %v1784_v37, %s2969_s13  ;;  %v2702_v46 = vpop.f32.mrb[21].mxu1 }
 0x361   :  { %v2018_v34 = vpop.f32.mrb[22].mxu1 }
 0x362   :  { %2292 = vrot.lane.b32.xlu1 %v1901_v32, %s2970_s14  ;;  %2294 = vrot.lane.b32.xlu0 %v2018_v34, %s2970_s14  ;;  %v2716_v47 = vpop.f32.mrb[23].mxu1 }
 0x365   :  { %v2135_v48 = vpop.f32.mrb[20].mxu0  ;;  %v2252_v50 = vpop.f32.mrb[24].mxu1 }
 0x366   :  { %2298 = vrot.lane.b32.xlu0 %v2252_v50, %s2970_s14  ;;  %v2730_v53 = vpop.f32.mrb[25].mxu1  ;;  %2296 = vrot.lane.b32.xlu1 %v2135_v48, %s2970_s14  ;;  %v2723_v52 = vpop.f32.mrb[21].mxu0 }
 0x369   :  { %v2261_v55 = vpop.permute.xlu0 %2260 }
 0x36a   :  { %v2305_v6 = vsel %vm2304_vm3, %v3328_v1, %v2261_v55 }
 0x37d   :  { %v2263_v54 = vpop.permute.xlu1 %2262 }
 0x37e   :  { %v2306_v56 = vsel %vm2304_vm3, %v3330_v22, %v2263_v54 }
 0x392   :  { %v2265_v57 = vpop.permute.xlu1 %2264 }
 0x393   :  { %v2307_v63 = vsel %vm2304_vm3, %v3332_v20, %v2265_v57 }
 0x3c8   :  { %v2267_v60 = vpop.permute.xlu1 %2266 }
 0x3c9   :  { %v2308_v14 = vsel %vm2304_vm3, %v3334_v25, %v2267_v60 }
 0x3cc   :  { %v2277_v61 = vpop.permute.xlu1 %2276  ;;  %v2279_v62 = vpop.permute.xlu0 %2278 }
 0x3cd   :  { %v2309_v3 = vsel %vm447_vm2, %v2305_v6, %v2277_v61  ;;  %v2310_v7 = vsel %vm447_vm2, %v2306_v56, %v2279_v62 }
 0x3d0   :  { %v2281_v2 = vpop.permute.xlu1 %2280  ;;  %v2283_v4 = vpop.permute.xlu0 %2282 }
 0x3d1   :  { %v2311_v15 = vsel %vm447_vm2, %v2307_v63, %v2281_v2  ;;  %v2312_v16 = vsel %vm447_vm2, %v2308_v14, %v2283_v4 }
 0x3d4   :  { %v2293_v8 = vpop.permute.xlu1 %2292  ;;  %v2295_v9 = vpop.permute.xlu0 %2294 }
 0x3d5   :  { %v2314_v10 = vsel %vm2313_vm4, %v2309_v3, %v2293_v8  ;;  %v2315_v12 = vsel %vm2313_vm4, %v2310_v7, %v2295_v9 }
 0x3d6   :  { %v2319_v13 = vadd.f32 %v2318_v0, %v2314_v10  ;;  %v2320_v59 = vadd.f32 %v2318_v0, %v2315_v12 }
 0x3d8   :  { %v2297_v58 = vpop.permute.xlu1 %2296  ;;  %2739 = vmatprep.mubr.msk.f32.mxu0 %vm61_vm0, %v2319_v13  ;;  %v2299_v18 = vpop.permute.xlu0 %2298 }
 0x3d9   :  { %v2316_v19 = vsel %vm2313_vm4, %v2311_v15, %v2297_v58  ;;  %v2317_v1 = vsel %vm2313_vm4, %v2312_v16, %v2299_v18  ;;  %2740 = vmatmul.mubr.msk.f32.vlgmr.msra.gmra.mrb[22].mxu0 %vm61_vm0, %v2320_v59 }
 0x3da   :  { %v2321_v21 = vadd.f32 %v2318_v0, %v2316_v19  ;;  %v2322_v22 = vadd.f32 %v2318_v0, %v2317_v1 }
 0x3dc   :  { %2742 = vmatprep.mubr.msk.f32.mxu0 %vm61_vm0, %v2321_v21 }
 0x3dd   :  { %2743 = vmatmul.mubr.msk.f32.gmra.mrb[24].mxu0 %vm61_vm0, %v2322_v22 }
 0x4ac   :  { %v2741_v20 = vpop.f32.mrb[22].mxu0 }
 0x4ad   :  { %v2418_v27 = vadd.f32 %v2741_v20, %v2494_v24  ;;  %v2412_v25 = vpop.f32.mrb[23].mxu0 }
 0x4ae   :  { %v2413_v44 = vadd.f32 %v2494_v24, %v2412_v25 }
 0x4af   :  { %v2432_v51 = vmax.f32 %v2418_v27, 0.0 }
 0x4b0   :  { %v2431_v49 = vmax.f32 %v2413_v44, 0.0  ;;  %v2744_v5 = vpop.f32.mrb[24].mxu0 }
 0x4b1   :  { %v2436_v28 = vadd.f32 %v2432_v51, %v2320_v59  ;;  %v2428_v29 = vadd.f32 %v2744_v5, %v2494_v24  ;;  %v2422_v11 = vpop.f32.mrb[25].mxu0 }
 0x4b2   :  { %v2435_v17 = vadd.f32 %v2431_v49, %v2319_v13  ;;  %v2423_v23 = vadd.f32 %v2494_v24, %v2422_v11 }
 0x4b3   :  { %2440 = vst.msk [vmem:[#allocation5 + $0x8] sm:$0xff] %vm61_vm0, %v2436_v28  ;;  %v2434_v30 = vmax.f32 %v2428_v29, 0.0 }
 0x4b4   :  { %2439 = vst.msk [vmem:[#allocation5] sm:$0xff] %vm61_vm0, %v2435_v17  ;;  %v2433_v31 = vmax.f32 %v2423_v23, 0.0 }
 0x4b5   :  { %v2438_v32 = vadd.f32 %v2434_v30, %v2322_v22 }
 0x4b6   :  { %v2437_v33 = vadd.f32 %v2433_v31, %v2321_v21 }
 0x4b7   :  { %2442 = vst.msk [vmem:[#allocation5 + $0x18] sm:$0xff] %vm61_vm0, %v2438_v32 }
 0x4b8   :  { %2441 = vst.msk [vmem:[#allocation5 + $0x10] sm:$0xff] %vm61_vm0, %v2437_v33 }
 0x4b9   :  { %2946 = shalt.err (!%p2943_p12)
}
 0x4ba   :  { %s2947_s19 = scalar_lea.hbm %s3400_s8, 512 }
 0x4bb   :  { %p2948_p13 = scmp.ne.s32.totalorder %s3400_s8, %s2947_s19  ;;  %p2951_p0 = scmp.lt.u32.totalorder %s2947_s19, %s3400_s8 }
 0x4bd   :  { %p2953_p1 = pnand %p2951_p0, %p2948_p13 }
 0x4bf   :  { %2956 = shalt.err (!%p2953_p1)
}
 0x4c0   :  { %s2972_s24 = smov 128  }
 0x4c1   :  { %2454 = dma.vmem_to_hbm [thread:$0]  %s2449_s16, 512, %s3400_s8, [#allocation4], %s2972_s24, %s2972_s24, %s2968_s27  }
 0x4c2   :  { %2959 = dma.done.wait [#allocation4], 512  }
 0x4c3   :  { %2960 = vsyncadd [#allocation4], 4294966784 }
 0x4c4   :  { %2458 = vsyncpa [#allocation3], 1 }
 0x4c5   :  { %2459 = vsyncpa [#allocation4], 1 }

</bundles_post_ra>
